<compile_context>
chip_gen: v6e
topology: v6e:2x2x1
jax: 0.10.0
libtpu: 0.0.40
codegen_flags: <defaults>
</compile_context>

<pallas_src>
import jax
import jax.numpy as jnp
from jax import lax
from jax.experimental import pallas as pl
from jax.experimental.pallas import tpu as pltpu


# --------------------------------------------------------------------------------------
# Fused kernel: one-hot embedding gather + attention + single-step LSTM cell + fc_out
# --------------------------------------------------------------------------------------
def decoder_step_kernel(tok_ref, h_ref, c_ref, enc_ref,
                        emb_tbl_ref, w_attn_ref, ba_ref, v_ref,
                        w_gates_ref, b_gates_ref, wout_ref, bout_ref,
                        pred_ref, h_out_ref, c_out_ref):
    B, S, H = enc_ref.shape
    V, E = emb_tbl_ref.shape
    bf16 = jnp.bfloat16

    # ---- embedding lookup: one-hot [B,V] @ [V,E] MXU gather (table is VMEM-resident) ----
    iota_v = lax.broadcasted_iota(jnp.int32, (B, V), 1)
    onehot = (tok_ref[...] == iota_v).astype(bf16)                               # [B, V]
    emb = jnp.dot(onehot, emb_tbl_ref[...],
                  preferred_element_type=jnp.float32).astype(bf16)               # [B, E]

    h = h_ref[...]                                                               # [B, H] f32
    c = c_ref[...]                                                               # [B, H] f32
    enc = enc_ref[...]                                                           # [B, S, H] f32
    h_bf = h.astype(bf16)
    enc_flat_bf = enc.reshape(B * S, H).astype(bf16)

    # ---- attention: a = softmax_S( v . tanh(W_a [h; enc] + b_a) ), one fused matmul ----
    h_rep = jnp.broadcast_to(h_bf[:, None, :], (B, S, H)).reshape(B * S, H)      # [B*S, H]
    attn_lhs = jnp.concatenate([h_rep, enc_flat_bf], axis=-1)                    # [B*S, 2H]
    energy = jnp.tanh(
        jnp.dot(attn_lhs, w_attn_ref[...],
                preferred_element_type=jnp.float32).reshape(B, S, H)
        + ba_ref[...][None, :, :])                                               # [B, S, H]
    scores = jnp.sum(energy * v_ref[...][None, :, :], axis=-1)                   # [B, S]
    scores_max = jnp.max(scores, axis=1, keepdims=True)
    p = jnp.exp(scores - scores_max)
    denom = jnp.sum(p, axis=1, keepdims=True)
    a = p * pl.reciprocal(denom, approx=True)                                    # softmax over S
    context = jnp.sum(a[:, :, None] * enc, axis=1)                               # [B, H] (torch.bmm)

    # ---- single-step LSTM cell, ONE gate matmul (PyTorch gate order: i, f, g, o) ----
    gates_lhs = jnp.concatenate([emb, context.astype(bf16), h_bf], axis=-1)      # [B, E+2H]
    gates = (jnp.dot(gates_lhs, w_gates_ref[...], preferred_element_type=jnp.float32)
             + b_gates_ref[...])                                                 # [B, 4H] f32
    i_g = jax.nn.sigmoid(gates[:, 0 * H:1 * H])
    f_g = jax.nn.sigmoid(gates[:, 1 * H:2 * H])
    g_g = jnp.tanh(gates[:, 2 * H:3 * H])
    o_g = jax.nn.sigmoid(gates[:, 3 * H:4 * H])
    c_new = f_g * c + i_g * g_g
    h_new = o_g * jnp.tanh(c_new)

    # ---- fused fc_out projection (lane-dense [B, V] store) ----
    pred_ref[...] = (jnp.dot(h_new.astype(bf16), wout_ref[...],
                             preferred_element_type=jnp.float32)
                     + bout_ref[...])
    h_out_ref[...] = h_new
    c_out_ref[...] = c_new


# --------------------------------------------------------------------------------------
# One-time parameter preparation (bf16 casts + weight concats hoisted out of forward)
# --------------------------------------------------------------------------------------
def prepare_params(params):
    bf16 = jnp.bfloat16
    return {
        "emb_tbl": params["embedding"].astype(bf16),                              # [V, E]
        "w_attn": jnp.concatenate([params["wah"], params["wae"]],
                                  axis=0).astype(bf16),                           # [2H, H]
        "ba": params["ba"],                                                       # [1, H] f32
        "v_row": params["v_row"],                                                 # [1, H] f32
        "w_gates": jnp.concatenate([params["wih_e"], params["wih_c"],
                                    params["whh"]], axis=0).astype(bf16),         # [E+2H, 4H]
        "b_gates": params["bih"] + params["bhh"],                                 # [1, 4H] f32
        "wout": params["wout"].astype(bf16),                                      # [H, V]
        "bout": params["bout"],                                                   # [1, V] f32
    }


# --------------------------------------------------------------------------------------
# Wrapper mirroring Decoder.forward: (prediction [B,V], hidden [1,B,H], cell [1,B,H])
# --------------------------------------------------------------------------------------
def decoder_forward(prep, input_token, hidden, cell, encoder_outputs):
    B, S, H = encoder_outputs.shape
    V, E = prep["emb_tbl"].shape

    # guard indices (out-of-range ids would produce a zero one-hot row otherwise)
    tok = jnp.clip(input_token.reshape(B, 1).astype(jnp.int32), 0, V - 1)
    h0 = hidden[-1]      # last (only) layer's state, [B, H]
    c0 = cell[-1]

    vmem = pl.BlockSpec(memory_space=pltpu.MemorySpace.VMEM)

    pred, h_new, c_new = pl.pallas_call(
        decoder_step_kernel,
        out_shape=(jax.ShapeDtypeStruct((B, V), jnp.float32),
                   jax.ShapeDtypeStruct((B, H), jnp.float32),
                   jax.ShapeDtypeStruct((B, H), jnp.float32)),
        in_specs=[vmem] * 12,
        out_specs=(vmem, vmem, vmem),
        compiler_params=pltpu.CompilerParams(vmem_limit_bytes=32 * 1024 * 1024),
        cost_estimate=pl.CostEstimate(
            flops=2 * B * (V * E + S * 2 * H * H + S * H + (E + 2 * H) * 4 * H + H * V),
            transcendentals=B * (S * H + S + 4 * H + H + 1),
            bytes_accessed=((V * E + 2 * H * H + (E + 2 * H) * 4 * H + H * V) * 2
                            + B * S * H * 4 + B * V * 4 + 4 * B * H * 4)),
    )(tok, h0, c0, encoder_outputs,
      prep["emb_tbl"], prep["w_attn"], prep["ba"], prep["v_row"],
      prep["w_gates"], prep["b_gates"], prep["wout"], prep["bout"])

    return pred, h_new[None], c_new[None]


# --------------------------------------------------------------------------------------
# Pure-JAX reference (same bf16 casts / fused weights) for a sanity check
# --------------------------------------------------------------------------------------
def decoder_reference(prep, input_token, hidden, cell, encoder_outputs):
    B, S, H = encoder_outputs.shape
    V, E = prep["emb_tbl"].shape
    bf16 = jnp.bfloat16
    tok = jnp.clip(input_token.reshape(B).astype(jnp.int32), 0, V - 1)
    h, c = hidden[-1], cell[-1]
    emb = jnp.take(prep["emb_tbl"], tok, axis=0)                                 # [B, E] bf16
    h_bf = h.astype(bf16)
    enc = encoder_outputs
    enc_bf = enc.reshape(B * S, H).astype(bf16)
    h_rep = jnp.broadcast_to(h_bf[:, None, :], (B, S, H)).reshape(B * S, H)
    attn_lhs = jnp.concatenate([h_rep, enc_bf], axis=-1)
    energy = jnp.tanh(jnp.dot(attn_lhs, prep["w_attn"],
                              preferred_element_type=jnp.float32).reshape(B, S, H)
                      + prep["ba"][None, :, :])
    scores = jnp.sum(energy * prep["v_row"][None, :, :], axis=-1)
    a = jax.nn.softmax(scores, axis=-1)
    context = jnp.sum(a[:, :, None] * enc, axis=1)
    gates_lhs = jnp.concatenate([emb, context.astype(bf16), h_bf], axis=-1)
    gates = (jnp.dot(gates_lhs, prep["w_gates"], preferred_element_type=jnp.float32)
             + prep["b_gates"])
    i_g = jax.nn.sigmoid(gates[:, 0 * H:1 * H])
    f_g = jax.nn.sigmoid(gates[:, 1 * H:2 * H])
    g_g = jnp.tanh(gates[:, 2 * H:3 * H])
    o_g = jax.nn.sigmoid(gates[:, 3 * H:4 * H])
    c_new = f_g * c + i_g * g_g
    h_new = o_g * jnp.tanh(c_new)
    pred = (jnp.dot(h_new.astype(bf16), prep["wout"],
                    preferred_element_type=jnp.float32) + prep["bout"])
    return pred, h_new[None], c_new[None]


def init_params(key, output_dim, embed_dim, hidden_dim):
    V, E, H = output_dim, embed_dim, hidden_dim
    ks = jax.random.split(key, 12)
    s = 0.1
    return {
        # nn.Embedding(output_dim, embed_dim)
        "embedding": s * jax.random.normal(ks[0], (V, E), jnp.float32),
        # Attention: nn.Linear(2H, H) split into hidden / encoder parts, pre-transposed [in,out]
        "wah": s * jax.random.normal(ks[1], (H, H), jnp.float32),
        "wae": s * jax.random.normal(ks[2], (H, H), jnp.float32),
        "ba":  s * jax.random.normal(ks[3], (1, H), jnp.float32),
        # Attention: nn.Linear(H, 1, bias=False) stored as a row vector [1, H]
        "v_row": s * jax.random.normal(ks[4], (1, H), jnp.float32),
        # nn.LSTM(H + E, H): weight_ih_l0 [4H, E+H] split into embed / context parts, pre-transposed
        "wih_e": s * jax.random.normal(ks[5], (E, 4 * H), jnp.float32),
        "wih_c": s * jax.random.normal(ks[6], (H, 4 * H), jnp.float32),
        "bih":   s * jax.random.normal(ks[7], (1, 4 * H), jnp.float32),
        # weight_hh_l0 [4H, H], pre-transposed
        "whh":   s * jax.random.normal(ks[8], (H, 4 * H), jnp.float32),
        "bhh":   s * jax.random.normal(ks[9], (1, 4 * H), jnp.float32),
        # nn.Linear(H, output_dim), pre-transposed
        "wout":  s * jax.random.normal(ks[10], (H, V), jnp.float32),
        "bout":  s * jax.random.normal(ks[11], (1, V), jnp.float32),
    }


if __name__ == "__main__":
    # TPU-aligned small shapes: H % 128 == 0, B % 8 == 0
    B, S = 8, 8
    OUTPUT_DIM = 1024        # target vocab size
    EMBED_DIM = 128
    HIDDEN_DIM = 128

    key = jax.random.PRNGKey(0)
    kp, kt, kh, kc, ke = jax.random.split(key, 5)

    params = init_params(kp, OUTPUT_DIM, EMBED_DIM, HIDDEN_DIM)
    prep = prepare_params(params)          # bf16 casts + weight concats done ONCE
    prep = jax.tree_util.tree_map(jax.block_until_ready, prep)

    input_token = jax.random.randint(kt, (B,), 0, OUTPUT_DIM, dtype=jnp.int32)   # [B]
    hidden = jax.random.normal(kh, (1, B, HIDDEN_DIM), jnp.float32)               # [num_layers, B, H]
    cell = jax.random.normal(kc, (1, B, HIDDEN_DIM), jnp.float32)
    encoder_outputs = jax.random.normal(ke, (B, S, HIDDEN_DIM), jnp.float32)      # [B, S, H]

    pred, h_new, c_new = decoder_forward(prep, input_token, hidden, cell, encoder_outputs)
    jax.block_until_ready((pred, h_new, c_new))

    assert pred.shape == (B, OUTPUT_DIM)
    assert h_new.shape == (1, B, HIDDEN_DIM)
    assert c_new.shape == (1, B, HIDDEN_DIM)

    # sanity check against a pure-JAX reference with the same bf16 weight casts
    ref_pred, ref_h, ref_c = decoder_reference(prep, input_token, hidden, cell, encoder_outputs)
    assert jnp.allclose(pred, ref_pred, atol=3e-2, rtol=3e-2)
    assert jnp.allclose(h_new, ref_h, atol=3e-2, rtol=3e-2)
    assert jnp.allclose(c_new, ref_c, atol=3e-2, rtol=3e-2)

    print("KERNEL_OK")
</pallas_src>

<mosaic_0001>
module attributes {stable_mosaic.version = 11 : i64} {
  func.func @decoder_step_kernel(%arg0: memref<8x1xi32, #tpu.memory_space<vmem>>, %arg1: memref<8x128xf32, #tpu.memory_space<vmem>>, %arg2: memref<8x128xf32, #tpu.memory_space<vmem>>, %arg3: memref<8x8x128xf32, #tpu.memory_space<vmem>>, %arg4: memref<1024x128xbf16, #tpu.memory_space<vmem>>, %arg5: memref<256x128xbf16, #tpu.memory_space<vmem>>, %arg6: memref<1x128xf32, #tpu.memory_space<vmem>>, %arg7: memref<1x128xf32, #tpu.memory_space<vmem>>, %arg8: memref<384x512xbf16, #tpu.memory_space<vmem>>, %arg9: memref<1x512xf32, #tpu.memory_space<vmem>>, %arg10: memref<128x1024xbf16, #tpu.memory_space<vmem>>, %arg11: memref<1x1024xf32, #tpu.memory_space<vmem>>, %arg12: memref<8x1024xf32, #tpu.memory_space<vmem>>, %arg13: memref<8x128xf32, #tpu.memory_space<vmem>>, %arg14: memref<8x128xf32, #tpu.memory_space<vmem>>) attributes {dimension_semantics = [], scalar_prefetch = 0 : i64, scratch_operands = 0 : i64, tpu.core_type = #tpu.core_type<tc>} {
    %0 = tpu.iota {dimensions = array<i32: 1>} : vector<8x1024xi32>
    %c0 = arith.constant 0 : index
    %c0_0 = arith.constant 0 : index
    %1 = vector.load %arg0[%c0, %c0_0] : memref<8x1xi32, #tpu.memory_space<vmem>>, vector<8x1xi32>
    %2 = vector.broadcast %1 : vector<8x1xi32> to vector<8x1024xi32>
    %3 = arith.cmpi eq, %2, %0 : vector<8x1024xi32>
    %4 = arith.extui %3 : vector<8x1024xi1> to vector<8x1024xi32>
    %5 = arith.sitofp %4 : vector<8x1024xi32> to vector<8x1024xf32>
    %6 = arith.truncf %5 : vector<8x1024xf32> to vector<8x1024xbf16>
    %c0_1 = arith.constant 0 : index
    %c0_2 = arith.constant 0 : index
    %7 = vector.load %arg4[%c0_1, %c0_2] : memref<1024x128xbf16, #tpu.memory_space<vmem>>, vector<1024x128xbf16>
    %cst = arith.constant dense<0.000000e+00> : vector<8x128xf32>
    %8 = tpu.matmul %6, %7, %cst {dimension_numbers = #tpu.dot_dimension_numbers<[1], [0], [0], [1], [0, 0, 1, 1], [], []>} : vector<8x1024xbf16>, vector<1024x128xbf16>, vector<8x128xf32> -> vector<8x128xf32>
    %9 = arith.truncf %8 : vector<8x128xf32> to vector<8x128xbf16>
    %c0_3 = arith.constant 0 : index
    %c0_4 = arith.constant 0 : index
    %10 = vector.load %arg1[%c0_3, %c0_4] : memref<8x128xf32, #tpu.memory_space<vmem>>, vector<8x128xf32>
    %c0_5 = arith.constant 0 : index
    %c0_6 = arith.constant 0 : index
    %11 = vector.load %arg2[%c0_5, %c0_6] : memref<8x128xf32, #tpu.memory_space<vmem>>, vector<8x128xf32>
    %c0_7 = arith.constant 0 : index
    %c0_8 = arith.constant 0 : index
    %c0_9 = arith.constant 0 : index
    %12 = vector.load %arg3[%c0_7, %c0_8, %c0_9] : memref<8x8x128xf32, #tpu.memory_space<vmem>>, vector<8x8x128xf32>
    %13 = arith.truncf %10 : vector<8x128xf32> to vector<8x128xbf16>
    %14 = vector.shape_cast %12 : vector<8x8x128xf32> to vector<64x128xf32>
    %15 = arith.truncf %14 : vector<64x128xf32> to vector<64x128xbf16>
    %16 = vector.shape_cast %13 : vector<8x128xbf16> to vector<8x1x128xbf16>
    %17 = vector.shape_cast %16 : vector<8x1x128xbf16> to vector<8x1x128xbf16>
    %18 = vector.broadcast %17 : vector<8x1x128xbf16> to vector<8x8x128xbf16>
    %19 = vector.shape_cast %18 : vector<8x8x128xbf16> to vector<64x128xbf16>
    %20 = tpu.concatenate %19, %15 in 1 : vector<64x128xbf16>, vector<64x128xbf16> -> vector<64x256xbf16>
    %c0_10 = arith.constant 0 : index
    %c0_11 = arith.constant 0 : index
    %21 = vector.load %arg5[%c0_10, %c0_11] : memref<256x128xbf16, #tpu.memory_space<vmem>>, vector<256x128xbf16>
    %cst_12 = arith.constant dense<0.000000e+00> : vector<64x128xf32>
    %22 = tpu.matmul %20, %21, %cst_12 {dimension_numbers = #tpu.dot_dimension_numbers<[1], [0], [0], [1], [0, 0, 1, 1], [], []>} : vector<64x256xbf16>, vector<256x128xbf16>, vector<64x128xf32> -> vector<64x128xf32>
    %23 = vector.shape_cast %22 : vector<64x128xf32> to vector<8x8x128xf32>
    %c0_13 = arith.constant 0 : index
    %c0_14 = arith.constant 0 : index
    %24 = vector.load %arg6[%c0_13, %c0_14] : memref<1x128xf32, #tpu.memory_space<vmem>>, vector<1x128xf32>
    %25 = vector.shape_cast %24 : vector<1x128xf32> to vector<1x1x128xf32>
    %26 = vector.broadcast %25 : vector<1x1x128xf32> to vector<8x8x128xf32>
    %27 = arith.addf %23, %26 : vector<8x8x128xf32>
    %28 = math.tanh %27 : vector<8x8x128xf32>
    %c0_15 = arith.constant 0 : index
    %c0_16 = arith.constant 0 : index
    %29 = vector.load %arg7[%c0_15, %c0_16] : memref<1x128xf32, #tpu.memory_space<vmem>>, vector<1x128xf32>
    %30 = vector.shape_cast %29 : vector<1x128xf32> to vector<1x1x128xf32>
    %31 = vector.broadcast %30 : vector<1x1x128xf32> to vector<8x8x128xf32>
    %32 = arith.mulf %28, %31 : vector<8x8x128xf32>
    %cst_17 = arith.constant dense<0.000000e+00> : vector<8x8xf32>
    %33 = vector.multi_reduction <add>, %32, %cst_17 [2] : vector<8x8x128xf32> to vector<8x8xf32>
    %cst_18 = arith.constant dense<0xFF800000> : vector<8xf32>
    %34 = vector.multi_reduction <maximumf>, %33, %cst_18 [1] : vector<8x8xf32> to vector<8xf32>
    %35 = vector.shape_cast %34 : vector<8xf32> to vector<8x1xf32>
    %36 = vector.broadcast %35 : vector<8x1xf32> to vector<8x8xf32>
    %37 = arith.subf %33, %36 : vector<8x8xf32>
    %38 = math.exp %37 : vector<8x8xf32>
    %cst_19 = arith.constant dense<0.000000e+00> : vector<8xf32>
    %39 = vector.multi_reduction <add>, %38, %cst_19 [1] : vector<8x8xf32> to vector<8xf32>
    %40 = vector.shape_cast %39 : vector<8xf32> to vector<8x1xf32>
    %41 = tpu.reciprocal %40 {approx = true} : vector<8x1xf32> -> vector<8x1xf32>
    %42 = vector.broadcast %41 : vector<8x1xf32> to vector<8x8xf32>
    %43 = arith.mulf %38, %42 : vector<8x8xf32>
    %44 = vector.shape_cast %43 : vector<8x8xf32> to vector<8x8x1xf32>
    %45 = vector.broadcast %44 : vector<8x8x1xf32> to vector<8x8x128xf32>
    %46 = arith.mulf %45, %12 : vector<8x8x128xf32>
    %cst_20 = arith.constant dense<0.000000e+00> : vector<8x128xf32>
    %47 = vector.multi_reduction <add>, %46, %cst_20 [1] : vector<8x8x128xf32> to vector<8x128xf32>
    %48 = arith.truncf %47 : vector<8x128xf32> to vector<8x128xbf16>
    %49 = tpu.concatenate %9, %48, %13 in 1 : vector<8x128xbf16>, vector<8x128xbf16>, vector<8x128xbf16> -> vector<8x384xbf16>
    %c0_21 = arith.constant 0 : index
    %c0_22 = arith.constant 0 : index
    %50 = vector.load %arg8[%c0_21, %c0_22] : memref<384x512xbf16, #tpu.memory_space<vmem>>, vector<384x512xbf16>
    %cst_23 = arith.constant dense<0.000000e+00> : vector<8x512xf32>
    %51 = tpu.matmul %49, %50, %cst_23 {dimension_numbers = #tpu.dot_dimension_numbers<[1], [0], [0], [1], [0, 0, 1, 1], [], []>} : vector<8x384xbf16>, vector<384x512xbf16>, vector<8x512xf32> -> vector<8x512xf32>
    %c0_24 = arith.constant 0 : index
    %c0_25 = arith.constant 0 : index
    %52 = vector.load %arg9[%c0_24, %c0_25] : memref<1x512xf32, #tpu.memory_space<vmem>>, vector<1x512xf32>
    %53 = vector.broadcast %52 : vector<1x512xf32> to vector<8x512xf32>
    %54 = arith.addf %51, %53 : vector<8x512xf32>
    %55 = vector.extract_strided_slice %54 {offsets = [0, 0], sizes = [8, 128], strides = [1, 1]} : vector<8x512xf32> to vector<8x128xf32>
    %56 = arith.negf %55 : vector<8x128xf32>
    %57 = math.exp %56 : vector<8x128xf32>
    %cst_26 = arith.constant 1.000000e+00 : f32
    %58 = vector.broadcast %cst_26 : f32 to vector<8x128xf32>
    %59 = arith.addf %58, %57 : vector<8x128xf32>
    %60 = arith.divf %58, %59 : vector<8x128xf32>
    %61 = vector.extract_strided_slice %54 {offsets = [0, 128], sizes = [8, 128], strides = [1, 1]} : vector<8x512xf32> to vector<8x128xf32>
    %62 = arith.negf %61 : vector<8x128xf32>
    %63 = math.exp %62 : vector<8x128xf32>
    %cst_27 = arith.constant 1.000000e+00 : f32
    %64 = vector.broadcast %cst_27 : f32 to vector<8x128xf32>
    %65 = arith.addf %64, %63 : vector<8x128xf32>
    %66 = arith.divf %64, %65 : vector<8x128xf32>
    %67 = vector.extract_strided_slice %54 {offsets = [0, 256], sizes = [8, 128], strides = [1, 1]} : vector<8x512xf32> to vector<8x128xf32>
    %68 = math.tanh %67 : vector<8x128xf32>
    %69 = vector.extract_strided_slice %54 {offsets = [0, 384], sizes = [8, 128], strides = [1, 1]} : vector<8x512xf32> to vector<8x128xf32>
    %70 = arith.negf %69 : vector<8x128xf32>
    %71 = math.exp %70 : vector<8x128xf32>
    %cst_28 = arith.constant 1.000000e+00 : f32
    %72 = vector.broadcast %cst_28 : f32 to vector<8x128xf32>
    %73 = arith.addf %72, %71 : vector<8x128xf32>
    %74 = arith.divf %72, %73 : vector<8x128xf32>
    %75 = arith.mulf %66, %11 : vector<8x128xf32>
    %76 = arith.mulf %60, %68 : vector<8x128xf32>
    %77 = arith.addf %75, %76 : vector<8x128xf32>
    %78 = math.tanh %77 : vector<8x128xf32>
    %79 = arith.mulf %74, %78 : vector<8x128xf32>
    %80 = arith.truncf %79 : vector<8x128xf32> to vector<8x128xbf16>
    %c0_29 = arith.constant 0 : index
    %c0_30 = arith.constant 0 : index
    %81 = vector.load %arg10[%c0_29, %c0_30] : memref<128x1024xbf16, #tpu.memory_space<vmem>>, vector<128x1024xbf16>
    %cst_31 = arith.constant dense<0.000000e+00> : vector<8x1024xf32>
    %82 = tpu.matmul %80, %81, %cst_31 {dimension_numbers = #tpu.dot_dimension_numbers<[1], [0], [0], [1], [0, 0, 1, 1], [], []>} : vector<8x128xbf16>, vector<128x1024xbf16>, vector<8x1024xf32> -> vector<8x1024xf32>
    %c0_32 = arith.constant 0 : index
    %c0_33 = arith.constant 0 : index
    %83 = vector.load %arg11[%c0_32, %c0_33] : memref<1x1024xf32, #tpu.memory_space<vmem>>, vector<1x1024xf32>
    %84 = vector.broadcast %83 : vector<1x1024xf32> to vector<8x1024xf32>
    %85 = arith.addf %82, %84 : vector<8x1024xf32>
    %c0_34 = arith.constant 0 : index
    %c0_35 = arith.constant 0 : index
    %86 = vector.load %arg12[%c0_34, %c0_35] : memref<8x1024xf32, #tpu.memory_space<vmem>>, vector<8x1024xf32>
    tpu.vector_store %arg12[%c0_34, %c0_35], %85 {strides = array<i32>} : memref<8x1024xf32, #tpu.memory_space<vmem>>, vector<8x1024xf32>,
    %c0_36 = arith.constant 0 : index
    %c0_37 = arith.constant 0 : index
    %87 = vector.load %arg13[%c0_36, %c0_37] : memref<8x128xf32, #tpu.memory_space<vmem>>, vector<8x128xf32>
    tpu.vector_store %arg13[%c0_36, %c0_37], %79 {strides = array<i32>} : memref<8x128xf32, #tpu.memory_space<vmem>>, vector<8x128xf32>,
    %c0_38 = arith.constant 0 : index
    %c0_39 = arith.constant 0 : index
    %88 = vector.load %arg14[%c0_38, %c0_39] : memref<8x128xf32, #tpu.memory_space<vmem>>, vector<8x128xf32>
    tpu.vector_store %arg14[%c0_38, %c0_39], %77 {strides = array<i32>} : memref<8x128xf32, #tpu.memory_space<vmem>>, vector<8x128xf32>,
    return
  }
}

</mosaic_0001>

<bundles_post_ra>
// kernel: tpu_custom_call.1
= control target key start
LH: loop header
LB: loop body
LE: loop exit
PB: predicated region body
PF: predicated region fallthrough
CT: control target
= control target key end

     0   :  { %20 = vsyncpa [#allocation3], 0  ;;  %s4411_s0 = inlined_call_operand.vmem [shape: s32[8,1], index: 0, kind: input, shape index: {}]   ;;  %s4412_s1 = inlined_call_operand.vmem [shape: f32[8,128], index: 1, kind: input, shape index: {}]   ;;  %s4413_s2 = inlined_call_operand.hbm [shape: f32[8,128], index: 2, kind: input, shape index: {}]   ;;  %s4414_s3 = inlined_call_operand.hbm [shape: f32[8,8,128], index: 3, kind: input, shape index: {}]   ;;  %s4415_s4 = inlined_call_operand.hbm [shape: bf16[1024,128], index: 4, kind: input, shape index: {}]   ;;  %s4416_s5 = inlined_call_operand.hbm [shape: bf16[256,128], index: 5, kind: input, shape index: {}]   ;;  %s4417_s6 = inlined_call_operand.vmem [shape: f32[1,128], index: 6, kind: input, shape index: {}]   ;;  %s4418_s7 = inlined_call_operand.hbm [shape: f32[1,128], index: 7, kind: input, shape index: {}]   ;;  %s4419_s8 = inlined_call_operand.hbm [shape: bf16[384,512], index: 8, kind: input, shape index: {}]   ;;  %s4420_s9 = inlined_call_operand.vmem [shape: f32[1,512], index: 9, kind: input, shape index: {}]   ;;  %s4421_s10 = inlined_call_operand.hbm [shape: bf16[128,1024], index: 10, kind: input, shape index: {}]   ;;  %s4422_s11 = inlined_call_operand.vmem [shape: f32[1,1024], index: 11, kind: input, shape index: {}]   ;;  %s4423_s12 = inlined_call_operand.hbm [shape: f32[8,1024], index: 12, kind: output, shape index: {0}]   ;;  %s4424_s13 = inlined_call_operand.hbm [shape: f32[8,128], index: 13, kind: output, shape index: {1}]   ;;  %s4425_s14 = inlined_call_operand.hbm [shape: f32[8,128], index: 14, kind: output, shape index: {2}]  }
   0x1   :  { %21 = vsyncpa [#allocation6], 0 }
   0x2   :  { %22 = vsyncpa [#allocation9], 0 }
   0x3   :  { %23 = vsyncpa [#allocation12], 0 }
   0x4   :  { %24 = vsyncpa [#allocation4], 0 }
   0x5   :  { %25 = vsyncpa [#allocation16], 0  ;;  %s3995_s29 = smov [#allocation5]  }
   0x6   :  { %s45_s30 = sshll.u32 %s3995_s29, 4  ;;  %s46_s30 = int_to_ptr.vmem [resolvable:$true] %s45_s30 }
   0x7   :  { %s3791_s15 = scalar_lea.vmem %s46_s30, 1024  ;;  %p3796_p1 = scmp.lt.s32.totalorder %s46_s30, %s46_s30 }
   0x8   :  { %p3792_p0 = scmp.ne.s32.totalorder %s46_s30, %s3791_s15  ;;  %p3797_p2 = scmp.lt.s32.totalorder %s3791_s15, %s3791_s15 }
   0xa   :  { %p3798_p3 = por %p3797_p2, %p3796_p1 }
   0xc   :  { %p3799_p4 = pnand %p3798_p3, %p3792_p0 }
   0xe   :  { %3802 = shalt.err (!%p3799_p4)
}
   0xf   :  { %s3996_s16 = smov 128   ;;  %s3997_s17 = smov 8  }
  0x10   :  { %51 = dma.hbm_to_vmem [thread:$0]  %s4414_s3, 1024, %s46_s30, [#allocation6], %s3996_s16, %s3996_s16, %s3997_s17  }
  0x11   :  { %s3998_s20 = smov [#allocation8]   ;;  %s3999_s22 = smov [#allocation11]  }
  0x12   :  { %s69_s21 = sshll.u32 %s3998_s20, 4  ;;  %s93_s23 = sshll.u32 %s3999_s22, 4  ;;  %s70_s21 = int_to_ptr.vmem [resolvable:$true] %s69_s21  ;;  %s94_s23 = int_to_ptr.vmem [resolvable:$true] %s93_s23 }
  0x13   :  { %s3811_s24 = scalar_lea.vmem %s70_s21, 2048  ;;  %p3816_p6 = scmp.lt.s32.totalorder %s70_s21, %s70_s21 }
  0x14   :  { %p3812_p5 = scmp.ne.s32.totalorder %s70_s21, %s3811_s24  ;;  %p3817_p7 = scmp.lt.s32.totalorder %s3811_s24, %s3811_s24 }
  0x16   :  { %p3818_p8 = por %p3817_p7, %p3816_p6 }
  0x18   :  { %p3819_p9 = pnand %p3818_p8, %p3812_p5 }
  0x1a   :  { %3822 = shalt.err (!%p3819_p9)
}
  0x1b   :  { %s4000_s25 = smov 64   ;;  %s4001_s26 = smov 4  }
  0x1c   :  { %75 = dma.hbm_to_vmem [thread:$0]  %s4416_s5, 2048, %s70_s21, [#allocation9], %s4000_s25, %s4000_s25, %s4001_s26  }
  0x1d   :  { %s3831_s3 = scalar_lea.vmem %s94_s23, 12288  ;;  %p3836_p11 = scmp.lt.s32.totalorder %s94_s23, %s94_s23 }
  0x1e   :  { %p3832_p10 = scmp.ne.s32.totalorder %s94_s23, %s3831_s3  ;;  %p3837_p12 = scmp.lt.s32.totalorder %s3831_s3, %s3831_s3 }
  0x20   :  { %p3838_p13 = por %p3837_p12, %p3836_p11 }
  0x22   :  { %p3839_p0 = pnand %p3838_p13, %p3832_p10 }
  0x24   :  { %3842 = shalt.err (!%p3839_p0)
}
  0x25   :  { %s4002_s29 = smov 256   ;;  %s4003_s30 = smov 16  }
  0x26   :  { %99 = dma.hbm_to_vmem [thread:$0]  %s4419_s8, 12288, %s94_s23, [#allocation12], %s4002_s29, %s4002_s29, %s4003_s30  }
  0x27   :  { %s4004_s17 = smov [#allocation2]   ;;  %s4005_s19 = smov [#allocation7]  }
  0x28   :  { %s36_s18 = sshll.u32 %s4004_s17, 4  ;;  %s57_s20 = sshll.u32 %s4005_s19, 4  ;;  %s37_s18 = int_to_ptr.vmem [resolvable:$true] %s36_s18  ;;  %s58_s20 = int_to_ptr.vmem [resolvable:$true] %s57_s20 }
  0x29   :  { %s3851_s5 = scalar_lea.vmem %s37_s18, 128  ;;  %p3856_p2 = scmp.lt.s32.totalorder %s37_s18, %s37_s18 }
  0x2a   :  { %p3852_p1 = scmp.ne.s32.totalorder %s37_s18, %s3851_s5  ;;  %p3857_p3 = scmp.lt.s32.totalorder %s3851_s5, %s3851_s5 }
  0x2c   :  { %p3858_p4 = por %p3857_p3, %p3856_p2 }
  0x2e   :  { %p3859_p5 = pnand %p3858_p4, %p3852_p1 }
  0x30   :  { %3862 = shalt.err (!%p3859_p5)
}
  0x31   :  { %39 = dma.hbm_to_vmem [thread:$0]  %s4413_s2, 128, %s37_s18, [#allocation3]  }
  0x32   :  { %s3871_s24 = scalar_lea.vmem %s58_s20, 8192  ;;  %p3876_p7 = scmp.lt.s32.totalorder %s58_s20, %s58_s20 }
  0x33   :  { %p3872_p6 = scmp.ne.s32.totalorder %s58_s20, %s3871_s24  ;;  %p3877_p8 = scmp.lt.s32.totalorder %s3871_s24, %s3871_s24 }
  0x35   :  { %p3878_p9 = por %p3877_p8, %p3876_p7 }
  0x37   :  { %p3879_p10 = pnand %p3878_p9, %p3872_p6 }
  0x39   :  { %3882 = shalt.err (!%p3879_p10)
}
  0x3a   :  { %63 = dma.hbm_to_vmem [thread:$0]  %s4415_s4, 8192, %s58_s20, [#allocation6], %s4000_s25, %s4000_s25, %s4001_s26  }
  0x3b   :  { %s4006_s27 = smov [#allocation10]   ;;  %s4007_s3 = smov [#allocation13]  }
  0x3c   :  { %s84_s28 = sshll.u32 %s4006_s27, 4  ;;  %s107_s2 = sshll.u32 %s4007_s3, 4  ;;  %s85_s28 = int_to_ptr.vmem [resolvable:$true] %s84_s28  ;;  %s108_s2 = int_to_ptr.vmem [resolvable:$true] %s107_s2 }
  0x3d   :  { %s3891_s29 = scalar_lea.vmem %s85_s28, 16  ;;  %s3895_s30 = scalar_lea.vmem %s85_s28, 32 }
  0x3e   :  { %p3892_p11 = scmp.ne.s32.totalorder %s85_s28, %s3891_s29  ;;  %p3896_p12 = scmp.lt.s32.totalorder %s85_s28, %s85_s28 }
  0x3f   :  { %p3897_p13 = scmp.lt.s32.totalorder %s3895_s30, %s3891_s29 }
  0x41   :  { %p3898_p0 = por %p3897_p13, %p3896_p12 }
  0x43   :  { %p3899_p1 = pnand %p3898_p0, %p3892_p11 }
  0x45   :  { %3902 = shalt.err (!%p3899_p1)
}
  0x46   :  { %87 = dma.hbm_to_vmem [thread:$0]  %s4418_s7, 16, %s85_s28, [#allocation9]  }
  0x47   :  { %s3911_s17 = scalar_lea.vmem %s108_s2, 8192  ;;  %p3916_p3 = scmp.lt.s32.totalorder %s108_s2, %s108_s2 }
  0x48   :  { %p3912_p2 = scmp.ne.s32.totalorder %s108_s2, %s3911_s17  ;;  %p3917_p4 = scmp.lt.s32.totalorder %s3911_s17, %s3911_s17 }
  0x4a   :  { %p3918_p5 = por %p3917_p4, %p3916_p3 }
  0x4c   :  { %p3919_p6 = pnand %p3918_p5, %p3912_p2 }
  0x4e   :  { %3922 = shalt.err (!%p3919_p6)
}
  0x4f   :  { %s4008_s4 = smov 512   ;;  %s4009_s25 = smov 32  }
  0x50   :  { %113 = dma.hbm_to_vmem [thread:$0]  %s4421_s10, 8192, %s108_s2, [#allocation12], %s4008_s4, %s4008_s4, %s4009_s25  }
  0x51   :  { %3983 = dma.done.wait [#allocation3], 128  }
  0x52   :  { %3984 = vsyncadd [#allocation3], 4294967168 }
  0x53   :  { %3985 = dma.done.wait [#allocation6], 9216  }
  0x54   :  { %3986 = vsyncadd [#allocation6], 4294958080 }
  0x55   :  { %3987 = dma.done.wait [#allocation9], 2064  }
  0x56   :  { %3988 = vsyncadd [#allocation9], 4294965232 }
  0x57   :  { %3989 = dma.done.wait [#allocation12], 20480  }
  0x58   :  { %3990 = vsyncadd [#allocation12], 4294946816  ;;  %v4010_v0 = vmov 0   ;;  %v147_v1 = vld [vmem:[%s4411_s0] sm:$0xff]  ;;  %v3509_v2 = vld [vmem:[#allocation7 + $0x78] sm:$0xff]   ;;  %v138_v36 = vlaneseq }
  0x59   :  { %3507 = vset.pattern.permute.xlu0 %v4010_v0  ;;  %3508 = vset.pattern.permute.xlu1 %v4010_v0  ;;  %v3510_v3 = vld [vmem:[#allocation7 + $0xf8] sm:$0xff]   ;;  %v3513_v6 = vld [vmem:[#allocation7 + $0x70] sm:$0xff]   ;;  %v3517_v10 = vld [vmem:[#allocation7 + $0x68] sm:$0xff]   ;;  %v4011_v45 = vmov 1.0|1.0  }
  0x5a   :  { %149 = vperm.xlu0 %3507, %v147_v1   ;;  %3358 = vmatprep.subr.bf16.mxu0 %v3509_v2  ;;  %v3511_v4 = vld [vmem:[#allocation7 + $0x38] sm:$0xff]   ;;  %v3514_v7 = vld [vmem:[#allocation7 + $0xf0] sm:$0xff]   ;;  %v3518_v11 = vld [vmem:[#allocation7 + $0xe8] sm:$0xff]   ;;  %v4124_v37 = vand.u32 127, %v138_v36 }
  0x5b   :  { %3380 = vmatprep.subr.bf16.mxu1 %v3510_v3  ;;  %v3512_v5 = vld [vmem:[#allocation7 + $0xb8] sm:$0xff]   ;;  %3359 = vmatpush3.bf16.msra.mxu0 %v3511_v4  ;;  %v3515_v8 = vld [vmem:[#allocation7 + $0x30] sm:$0xff]   ;;  %v3519_v12 = vld [vmem:[#allocation7 + $0x28] sm:$0xff]  }
  0x5c   :  { %3381 = vmatpush3.bf16.msra.mxu1 %v3512_v5  ;;  %3360 = vmatprep.subr.bf16.mxu0 %v3513_v6  ;;  %v3516_v9 = vld [vmem:[#allocation7 + $0xb0] sm:$0xff]   ;;  %v3520_v13 = vld [vmem:[#allocation7 + $0xa8] sm:$0xff]   ;;  %v3521_v14 = vld [vmem:[#allocation7 + $0x60] sm:$0xff]   ;;  %v140_v38 = vadd.s32 128, %v4124_v37  ;;  %v142_v39 = vadd.s32 384, %v4124_v37  ;;  %v141_v40 = vadd.s32 256, %v4124_v37 }
  0x5d   :  { %3382 = vmatprep.subr.bf16.mxu1 %v3514_v7  ;;  %v3522_v15 = vld [vmem:[#allocation7 + $0xe0] sm:$0xff]   ;;  %v3525_v18 = vld [vmem:[#allocation7 + $0x58] sm:$0xff]   ;;  %v3529_v22 = vld [vmem:[#allocation7 + $0x50] sm:$0xff]   ;;  %v144_v41 = vadd.s32 640, %v4124_v37  ;;  %v146_v43 = vadd.s32 896, %v4124_v37 }
  0x5e   :  { %v3523_v16 = vld [vmem:[#allocation7 + $0x20] sm:$0xff]   ;;  %v3526_v19 = vld [vmem:[#allocation7 + $0xd8] sm:$0xff]   ;;  %v3530_v23 = vld [vmem:[#allocation7 + $0xd0] sm:$0xff]   ;;  %v4012_v6 = vmov 1966171168  }
  0x5f   :  { %3361 = vmatpush3.bf16.msra.mxu0 %v3515_v8  ;;  %v3524_v17 = vld [vmem:[#allocation7 + $0xa0] sm:$0xff]   ;;  %v3527_v20 = vld [vmem:[#allocation7 + $0x18] sm:$0xff]   ;;  %v3531_v24 = vld [vmem:[#allocation7 + $0x10] sm:$0xff]   ;;  %v873_v7 = vunpack.c.l.s4 %v4012_v6 }
  0x60   :  { %3383 = vmatpush3.bf16.msra.mxu1 %v3516_v9  ;;  %3362 = vmatprep.subr.bf16.mxu0 %v3517_v10  ;;  %v3528_v21 = vld [vmem:[#allocation7 + $0x98] sm:$0xff]   ;;  %v3532_v25 = vld [vmem:[#allocation7 + $0x90] sm:$0xff]   ;;  %v3533_v26 = vld [vmem:[#allocation7 + $0x48] sm:$0xff]  }
  0x61   :  { %3384 = vmatprep.subr.bf16.mxu1 %v3518_v11  ;;  %v3534_v27 = vld [vmem:[#allocation7 + $0xc8] sm:$0xff]   ;;  %v3537_v30 = vld [vmem:[#allocation7 + $0x40] sm:$0xff]   ;;  %v3541_v34 = vld [vmem:[#allocation7 + $0x178] sm:$0xff]  }
  0x62   :  { %v3535_v28 = vld [vmem:[#allocation7 + $0x8] sm:$0xff]   ;;  %v3538_v31 = vld [vmem:[#allocation7 + $0xc0] sm:$0xff]   ;;  %v3542_v35 = vld [vmem:[#allocation7 + $0x1f8] sm:$0xff]  }
  0x63   :  { %3363 = vmatpush3.bf16.msra.mxu0 %v3519_v12  ;;  %v3536_v29 = vld [vmem:[#allocation7 + $0x88] sm:$0xff]   ;;  %v3539_v32 = vld [vmem:[#allocation7] sm:$0xff]   ;;  %v3543_v44 = vld [vmem:[#allocation7 + $0x138] sm:$0xff]   ;;  %v4147_v12 = vshrl.u32 %v138_v36, 7 }
  0x64   :  { %3385 = vmatpush3.bf16.msra.mxu1 %v3520_v13  ;;  %3364 = vmatprep.subr.bf16.mxu0 %v3521_v14  ;;  %v3540_v33 = vld [vmem:[#allocation7 + $0x80] sm:$0xff]   ;;  %v3544_v46 = vld [vmem:[#allocation7 + $0x1b8] sm:$0xff]   ;;  %v3545_v47 = vld [vmem:[#allocation7 + $0x170] sm:$0xff]   ;;  %v143_v13 = vadd.s32 512, %v4124_v37  ;;  %v874_v14 = vunpack.c.0.s8 %v873_v7 }
  0x65   :  { %3386 = vmatprep.subr.bf16.mxu1 %v3522_v15  ;;  %v3546_v48 = vld [vmem:[#allocation7 + $0x1f0] sm:$0xff]   ;;  %v3549_v51 = vld [vmem:[#allocation7 + $0x168] sm:$0xff]   ;;  %v3553_v55 = vld [vmem:[#allocation7 + $0x160] sm:$0xff]  }
  0x66   :  { %v3547_v49 = vld [vmem:[#allocation7 + $0x130] sm:$0xff]   ;;  %v3550_v52 = vld [vmem:[#allocation7 + $0x1e8] sm:$0xff]   ;;  %v3554_v56 = vld [vmem:[#allocation7 + $0x1e0] sm:$0xff]  }
  0x67   :  { %3365 = vmatpush3.bf16.msra.mxu0 %v3523_v16  ;;  %v3548_v50 = vld [vmem:[#allocation7 + $0x1b0] sm:$0xff]   ;;  %v3551_v53 = vld [vmem:[#allocation7 + $0x128] sm:$0xff]   ;;  %v3555_v57 = vld [vmem:[#allocation7 + $0x120] sm:$0xff]   ;;  %v145_v16 = vadd.s32 768, %v4124_v37 }
  0x68   :  { %3387 = vmatpush3.bf16.msra.mxu1 %v3524_v17  ;;  %3366 = vmatprep.subr.bf16.mxu0 %v3525_v18  ;;  %v3552_v54 = vld [vmem:[#allocation7 + $0x1a8] sm:$0xff]   ;;  %v3556_v58 = vld [vmem:[#allocation7 + $0x1a0] sm:$0xff]   ;;  %v3557_v59 = vld [vmem:[#allocation7 + $0x158] sm:$0xff]  }
  0x69   :  { %3388 = vmatprep.subr.bf16.mxu1 %v3526_v19  ;;  %v3558_v60 = vld [vmem:[#allocation7 + $0x1d8] sm:$0xff]   ;;  %v3561_v63 = vld [vmem:[#allocation7 + $0x150] sm:$0xff]   ;;  %v3565_v4 = vld [vmem:[#allocation7 + $0x148] sm:$0xff]  }
  0x6a   :  { %v3559_v61 = vld [vmem:[#allocation7 + $0x118] sm:$0xff]   ;;  %v3562_v1 = vld [vmem:[#allocation7 + $0x1d0] sm:$0xff]   ;;  %v3566_v5 = vld [vmem:[#allocation7 + $0x1c8] sm:$0xff]  }
  0x6b   :  { %3367 = vmatpush3.bf16.msra.mxu0 %v3527_v20  ;;  %v3560_v62 = vld [vmem:[#allocation7 + $0x198] sm:$0xff]   ;;  %v3563_v2 = vld [vmem:[#allocation7 + $0x110] sm:$0xff]   ;;  %v3567_v8 = vld [vmem:[#allocation7 + $0x108] sm:$0xff]  }
  0x6c   :  { %3389 = vmatpush3.bf16.msra.mxu1 %v3528_v21  ;;  %3368 = vmatprep.subr.bf16.mxu0 %v3529_v22  ;;  %v3564_v3 = vld [vmem:[#allocation7 + $0x190] sm:$0xff]   ;;  %v3568_v9 = vld [vmem:[#allocation7 + $0x188] sm:$0xff]   ;;  %v3569_v10 = vld [vmem:[#allocation7 + $0x140] sm:$0xff]  }
  0x6d   :  { %3390 = vmatprep.subr.bf16.mxu1 %v3530_v23  ;;  %v3570_v11 = vld [vmem:[#allocation7 + $0x1c0] sm:$0xff]   ;;  %v856_v17 = vld [vmem:[%s4412_s1] sm:$0xff]  ;;  %v3573_v19 = vld [vmem:[#allocation8 + $0x78] sm:$0xff]   ;;  %v877_v23 = vsub.s32 %v874_v14, %v4147_v12 }
  0x6e   :  { %v3571_v15 = vld [vmem:[#allocation7 + $0x100] sm:$0xff]   ;;  %v4156_v21 = vld [vmem:[#allocation5 + $0x8] sm:$0xff]  ;;  %v4159_v22 = vpack.c.bf16 %v856_v17, %v856_v17  ;;  %v3581_v36 = vld [vmem:[#allocation8 + $0x58] sm:$0xff]  }
  0x6f   :  { %3369 = vmatpush3.bf16.msra.mxu0 %v3531_v24  ;;  %v3572_v18 = vld [vmem:[#allocation7 + $0x180] sm:$0xff]   ;;  %v3574_v24 = vld [vmem:[#allocation8 + $0x38] sm:$0xff]  }
  0x70   :  { %3391 = vmatpush3.bf16.msra.mxu1 %v3532_v25  ;;  %3370 = vmatprep.subr.bf16.mxu0 %v3533_v26  ;;  %v4154_v20 = vld [vmem:[#allocation5] sm:$0xff]  ;;  %v3575_v25 = vld [vmem:[#allocation8 + $0x70] sm:$0xff]  }
  0x71   :  { %3392 = vmatprep.subr.bf16.mxu1 %v3534_v27  ;;  %v867_v26 = vpack.c.bf16 %v4156_v21, %v4154_v20  ;;  %v878_v27 = vrot.slane %v4159_v22, %v877_v23  ;;  %v4187_v14 = vld [vmem:[#allocation5 + $0x20] sm:$0xff] }
  0x73   :  { %3371 = vmatpush3.bf16.msra.mxu0 %v3535_v28  ;;  %v3576_v28 = vld [vmem:[#allocation8 + $0x30] sm:$0xff]  }
  0x74   :  { %3393 = vmatpush3.bf16.msra.mxu1 %v3536_v29  ;;  %3372 = vmatprep.subr.bf16.mxu0 %v3537_v30  ;;  %v3577_v29 = vld [vmem:[#allocation8 + $0x68] sm:$0xff]   ;;  %v886_v30 = vrot.slane %v878_v27, %v877_v23 }
  0x75   :  { %3394 = vmatprep.subr.bf16.mxu1 %v3538_v31  ;;  %v3578_v31 = vld [vmem:[#allocation8 + $0x28] sm:$0xff]  }
  0x77   :  { %3373 = vmatpush3.bf16.msra.mxu0 %v3539_v32  ;;  %v3579_v32 = vld [vmem:[#allocation8 + $0x60] sm:$0xff]  }
  0x78   :  { %3395 = vmatpush3.bf16.msra.mxu1 %v3540_v33  ;;  %3402 = vmatprep.subr.bf16.mxu0 %v3541_v34  ;;  %v897_v33 = vunpack.i.h.s16 %v886_v30  ;;  %v879_v34 = vcombine.high %v878_v27, %v878_v27 }
  0x79   :  { %3424 = vmatprep.subr.bf16.mxu1 %v3542_v35  ;;  %v3580_v35 = vld [vmem:[#allocation8 + $0x20] sm:$0xff]  }
  0xd5   :  { %v4130_v42 = vpop.permute.xlu0 %149 }
  0xd6   :  { %vm152_vm0 = vcmp.eq.s32.totalorder %v4130_v42, %v140_v38  ;;  %vm154_vm1 = vcmp.eq.s32.totalorder %v4130_v42, %v142_v39  ;;  %vm151_vm2 = vcmp.eq.s32.totalorder %v4130_v42, %v4124_v37  ;;  %vm153_vm4 = vcmp.eq.s32.totalorder %v4130_v42, %v141_v40 }
  0xd7   :  { %vm3153_vm3 = vmpackc.low %vm152_vm0, %vm152_vm0  ;;  %vm156_vm6 = vcmp.eq.s32.totalorder %v4130_v42, %v144_v41  ;;  %vm158_vm8 = vcmp.eq.s32.totalorder %v4130_v42, %v146_v43  ;;  %vm155_vm12 = vcmp.eq.s32.totalorder %v4130_v42, %v143_v13  ;;  %vm157_vm13 = vcmp.eq.s32.totalorder %v4130_v42, %v145_v16  ;;  %v3582_v42 = vld [vmem:[#allocation8 + $0x18] sm:$0xff]   ;;  %v3583_v43 = vld [vmem:[#allocation8 + $0x50] sm:$0xff]  }
  0xd8   :  { %3154 = vmatprep.mubr.msk.bf16.mxu0 %vm3153_vm3, %v4011_v45  ;;  %vm3157_vm5 = vmpackc.low %vm154_vm1, %vm154_vm1  ;;  %v4169_v38 = vsub.s32 0, %v4147_v12  ;;  %v3169_v39 = vpack.i.b16 %v886_v30, %v886_v30  ;;  %v905_v40 = vpack.i.b16 %v897_v33, %v897_v33  ;;  %v893_v41 = vrot.slane %v879_v34, %v877_v23 }
  0xd9   :  { %3158 = vmatprep.mubr.msk.bf16.mxu1 %vm3157_vm5, %v4011_v45  ;;  %vm3155_vm7 = vmpackc.low %vm151_vm2, %vm151_vm2  ;;  %vm1311_vm0 = vcmask 1041409   ;;  %vm1313_vm1 = vcmask 1042434   ;;  %vm1315_vm2 = vcmask 1043459   ;;  %vm1317_vm3 = vcmask 1044484  }
  0xda   :  { %3156 = vmatmul.mubr.msk.bf16.vlgmr.msra.gmra.mxu0 %vm3155_vm7, %v4011_v45  ;;  %vm3159_vm9 = vmpackc.low %vm153_vm4, %vm153_vm4  ;;  %vm1319_vm4 = vcmask 1045509   ;;  %vm1321_vm5 = vcmask 1046534   ;;  %vm1326_vm7 = vcmask 64512  }
  0xdb   :  { %3160 = vmatmul.mubr.msk.bf16.vlgmr.msra.gmra.mxu1 %vm3159_vm9, %v4011_v45  ;;  %3403 = vmatpush3.bf16.msra.mxu0 %v3543_v44  ;;  %vm3161_vm10 = vmpackc.low %vm156_vm6, %vm156_vm6  ;;  %v915_v44 = vrot.slane %v3169_v39, %v4169_v38  ;;  %vm1323_vm6 = vcmask 1047559  }
  0xdc   :  { %3425 = vmatpush3.bf16.msra.mxu1 %v3544_v46  ;;  %3162 = vmatprep.mubr.msk.bf16.mxu0 %vm3161_vm10, %v4011_v45  ;;  %vm3165_vm11 = vmpackc.low %vm158_vm8, %vm158_vm8  ;;  %v899_v46 = vunpack.i.h.s16 %v893_v41 }
  0xdd   :  { %3166 = vmatprep.mubr.msk.bf16.mxu1 %vm3165_vm11, %v4011_v45  ;;  %3404 = vmatprep.subr.bf16.mxu0 %v3545_v47  ;;  %vm3163_vm14 = vmpackc.low %vm155_vm12, %vm155_vm12  ;;  %v3584_v47 = vld [vmem:[#allocation8 + $0x10] sm:$0xff]  }
  0xde   :  { %3426 = vmatprep.subr.bf16.mxu1 %v3546_v48  ;;  %vm3167_vm15 = vmpackc.low %vm157_vm13, %vm157_vm13  ;;  %v3585_v48 = vld [vmem:[#allocation8 + $0x48] sm:$0xff]  }
  0xdf   :  { %3405 = vmatpush3.bf16.msra.mxu0 %v3547_v49  ;;  %v894_v49 = vcombine.high %v886_v30, %v886_v30  ;;  %v4199_v30 = vld [vmem:[#allocation5 + $0x38] sm:$0xff] }
  0xe0   :  { %3427 = vmatpush3.bf16.msra.mxu1 %v3548_v50  ;;  %3406 = vmatprep.subr.bf16.mxu0 %v3549_v51  ;;  %v945_v50 = vpack.i.b16 %v915_v44, %v915_v44 }
  0xe1   :  { %3428 = vmatprep.subr.bf16.mxu1 %v3550_v52  ;;  %v3170_v52 = vpack.i.b16 %v893_v41, %v893_v41 }
  0xe3   :  { %3407 = vmatpush3.bf16.msra.mxu0 %v3551_v53  ;;  %v907_v53 = vpack.i.b16 %v899_v46, %v899_v46 }
  0xe4   :  { %3429 = vmatpush3.bf16.msra.mxu1 %v3552_v54  ;;  %3408 = vmatprep.subr.bf16.mxu0 %v3553_v55  ;;  %v3586_v54 = vld [vmem:[#allocation8 + $0x8] sm:$0xff]   ;;  %v3587_v55 = vld [vmem:[#allocation8 + $0x40] sm:$0xff]  }
  0xe5   :  { %3430 = vmatprep.subr.bf16.mxu1 %v3554_v56  ;;  %v901_v56 = vunpack.i.h.s16 %v894_v49 }
  0xe7   :  { %3409 = vmatpush3.bf16.msra.mxu0 %v3555_v57  ;;  %v950_v57 = vrot.slane %v945_v50, %v4169_v38  ;;  %v909_v6 = vpack.i.b16 %v901_v56, %v901_v56 }
  0xe8   :  { %3431 = vmatpush3.bf16.msra.mxu1 %v3556_v58  ;;  %3410 = vmatprep.subr.bf16.mxu0 %v3557_v59  ;;  %v923_v59 = vrot.slane %v3170_v52, %v4169_v38 }
  0xe9   :  { %3432 = vmatprep.subr.bf16.mxu1 %v3558_v60  ;;  %v927_v60 = vrot.slane %v907_v53, %v4169_v38 }
  0xeb   :  { %3411 = vmatpush3.bf16.msra.mxu0 %v3559_v61  ;;  %v3588_v61 = vld [vmem:[#allocation8] sm:$0xff]  }
  0xec   :  { %3433 = vmatpush3.bf16.msra.mxu1 %v3560_v62  ;;  %3412 = vmatprep.subr.bf16.mxu0 %v3561_v63  ;;  %v4177_v62 = vld [vmem:[#allocation5 + $0x10] sm:$0xff]  ;;  %v4179_v63 = vld [vmem:[#allocation5 + $0x18] sm:$0xff] }
  0xed   :  { %3434 = vmatprep.subr.bf16.mxu1 %v3562_v1  ;;  %v3171_v1 = vpack.i.b16 %v894_v49, %v894_v49  ;;  %v868_v7 = vpack.c.bf16 %v4179_v63, %v4177_v62 }
  0xef   :  { %3413 = vmatpush3.bf16.msra.mxu0 %v3563_v2  ;;  %v895_v2 = vcombine.high %v893_v41, %v893_v41 }
  0xf0   :  { %3435 = vmatpush3.bf16.msra.mxu1 %v3564_v3  ;;  %3414 = vmatprep.subr.bf16.mxu0 %v3565_v4  ;;  %v959_v4 = vpack.i.b16 %v923_v59, %v923_v59 }
  0xf1   :  { %3436 = vmatprep.subr.bf16.mxu1 %v3566_v5  ;;  %v966_v5 = vpack.i.b16 %v927_v60, %v927_v60  ;;  %v903_v13 = vunpack.i.h.s16 %v895_v2  ;;  %v3172_v16 = vpack.i.b16 %v895_v2, %v895_v2 }
  0xf3   :  { %3415 = vmatpush3.bf16.msra.mxu0 %v3567_v8  ;;  %v931_v8 = vrot.slane %v3171_v1, %v4169_v38  ;;  %v911_v23 = vpack.i.b16 %v903_v13, %v903_v13  ;;  %v939_v27 = vrot.slane %v3172_v16, %v4169_v38 }
  0xf4   :  { %3437 = vmatpush3.bf16.msra.mxu1 %v3568_v9  ;;  %3416 = vmatprep.subr.bf16.mxu0 %v3569_v10  ;;  %v964_v9 = vrot.slane %v959_v4, %v4169_v38  ;;  %v971_v10 = vrot.slane %v966_v5, %v4169_v38  ;;  %v3193_v4 = vld [vmem:[%s4417_s6] ss:$0 sm:$0xff] }
  0xf5   :  { %3438 = vmatprep.subr.bf16.mxu1 %v3570_v11  ;;  %v935_v11 = vrot.slane %v909_v6, %v4169_v38 }
  0xf6   :  { %v3174_v17 = vcombine.low %v964_v9, %v971_v10 }
  0xf7   :  { %3417 = vmatpush3.bf16.msra.mxu0 %v3571_v15  ;;  %v4189_v15 = vld [vmem:[#allocation5 + $0x28] sm:$0xff] }
  0xf8   :  { %3439 = vmatpush3.bf16.msra.mxu1 %v3572_v18  ;;  %3446 = vmatprep.subr.bf16.mxu0 %v3573_v19  ;;  %v973_v18 = vpack.i.b16 %v931_v8, %v931_v8  ;;  %v980_v19 = vpack.i.b16 %v935_v11, %v935_v11 }
  0xfa   :  { %3164 = vmatmul.mubr.msk.bf16.vlgmr.msra.gmra.mxu0 %vm3163_vm14, %v4011_v45 }
  0xfb   :  { %3168 = vmatmul.mubr.msk.bf16.vlgmr.msra.gmra.mxu1 %vm3167_vm15, %v4011_v45  ;;  %3447 = vmatpush3.bf16.msra.mxu0 %v3574_v24  ;;  %v919_v45 = vrot.slane %v905_v40, %v4169_v38  ;;  %v869_v24 = vpack.c.bf16 %v4189_v15, %v4187_v14 }
  0xfc   :  { %3448 = vmatprep.subr.bf16.mxu0 %v3575_v25  ;;  %1184 = vmatprep.mubr.bf16.mxu0 %v867_v26  ;;  %v978_v25 = vrot.slane %v973_v18, %v4169_v38  ;;  %v985_v26 = vrot.slane %v980_v19, %v4169_v38 }
  0xfd   :  { %v952_v51 = vpack.i.b16 %v919_v45, %v919_v45 }
  0xff   :  { %3449 = vmatpush3.bf16.msra.mxu0 %v3576_v28  ;;  %v957_v58 = vrot.slane %v952_v51, %v4169_v38  ;;  %v943_v28 = vrot.slane %v911_v23, %v4169_v38 }
 0x100   :  { %3450 = vmatprep.subr.bf16.mxu0 %v3577_v29  ;;  %v4197_v29 = vld [vmem:[#allocation5 + $0x30] sm:$0xff] }
 0x101   :  { %v3173_v3 = vcombine.low %v950_v57, %v957_v58  ;;  %v994_v33 = vpack.i.b16 %v943_v28, %v943_v28  ;;  %v870_v34 = vpack.c.bf16 %v4199_v30, %v4197_v29 }
 0x103   :  { %3451 = vmatpush3.bf16.msra.mxu0 %v3578_v31  ;;  %v3175_v31 = vcombine.low %v978_v25, %v985_v26 }
 0x104   :  { %3452 = vmatprep.subr.bf16.mxu0 %v3579_v32  ;;  %v987_v32 = vpack.i.b16 %v939_v27, %v939_v27  ;;  %v3194_v27 = vld [vmem:[#allocation10] ss:$0 sm:$0xff] }
 0x107   :  { %3453 = vmatpush3.bf16.msra.mxu0 %v3580_v35  ;;  %v992_v35 = vrot.slane %v987_v32, %v4169_v38 }
 0x108   :  { %3454 = vmatprep.subr.bf16.mxu0 %v3581_v36  ;;  %v999_v36 = vrot.slane %v994_v33, %v4169_v38 }
 0x10a   :  { %v3176_v39 = vcombine.low %v992_v35, %v999_v36 }
 0x10b   :  { %3455 = vmatpush3.bf16.msra.mxu0 %v3582_v42 }
 0x10c   :  { %3456 = vmatprep.subr.bf16.mxu0 %v3583_v43 }
 0x10f   :  { %3457 = vmatpush3.bf16.msra.mxu0 %v3584_v47 }
 0x110   :  { %3458 = vmatprep.subr.bf16.mxu0 %v3585_v48 }
 0x113   :  { %3459 = vmatpush3.bf16.msra.mxu0 %v3586_v54 }
 0x114   :  { %3460 = vmatprep.subr.bf16.mxu0 %v3587_v55 }
 0x117   :  { %3461 = vmatpush3.bf16.msra.mxu0 %v3588_v61 }
 0x11a   :  { %1185 = vmatmul.mubr.bf16.vlgmr.msra.gmra.mxu0 %v3173_v3 }
 0x11b   :  { %1192 = vmatprep.mubr.bf16.mxu0 %v868_v7 }
 0x122   :  { %1193 = vmatmul.mubr.bf16.gmra.mxu0 %v3174_v17 }
 0x123   :  { %1200 = vmatprep.mubr.bf16.mxu0 %v869_v24 }
 0x12a   :  { %1201 = vmatmul.mubr.bf16.gmra.mxu0 %v3175_v31 }
 0x12b   :  { %1208 = vmatprep.mubr.bf16.mxu0 %v870_v34 }
 0x132   :  { %1209 = vmatmul.mubr.bf16.gmra.mxu0 %v3176_v39 }
 0x133   :  { %2320 = vmatprep.mubr.bf16.mxu0 %v4010_v0 }
 0x19a   :  { %v3374_v40 = vpop.f32.mrf.mxu0 }
 0x19b   :  { %v3396_v41 = vpop.f32.mrf.mxu1 }
 0x19c   :  { %v3375_v42 = vpop.f32.mrf.mxu0 }
 0x19d   :  { %v3376_v43 = vadd.f32 %v3375_v42, %v3374_v40  ;;  %v3397_v44 = vpop.f32.mrf.mxu1 }
 0x19e   :  { %v3398_v45 = vadd.f32 %v3397_v44, %v3396_v41  ;;  %v3377_v46 = vpop.f32.mrf.mxu0 }
 0x19f   :  { %v3399_v47 = vpop.f32.mrf.mxu1 }
 0x1a0   :  { %v770_v48 = vadd.f32 %v3398_v45, %v3376_v43  ;;  %v3378_v49 = vpop.f32.mrf.mxu0 }
 0x1a1   :  { %v3400_v50 = vpop.f32.mrf.mxu1 }
 0x1ba   :  { %v3418_v51 = vpop.f32.mrf.mxu0 }
 0x1bb   :  { %v3440_v52 = vpop.f32.mrf.mxu1 }
 0x1bc   :  { %v3419_v53 = vpop.f32.mrf.mxu0 }
 0x1bd   :  { %v3420_v54 = vadd.f32 %v3419_v53, %v3418_v51  ;;  %v3441_v55 = vpop.f32.mrf.mxu1 }
 0x1be   :  { %v3442_v56 = vadd.f32 %v3441_v55, %v3440_v52  ;;  %v3421_v57 = vpop.f32.mrf.mxu0 }
 0x1bf   :  { %v810_v58 = vadd.f32 %v3420_v54, %v770_v48  ;;  %v3443_v59 = vpop.f32.mrf.mxu1 }
 0x1c0   :  { %v3422_v60 = vpop.f32.mrf.mxu0 }
 0x1c1   :  { %v4206_v61 = vadd.f32 %v3442_v56, %v810_v58  ;;  %v3444_v1 = vpop.f32.mrf.mxu1 }
 0x1da   :  { %v3462_v2 = vpop.f32.mrf.mxu0 }
 0x1dc   :  { %v3463_v3 = vpop.f32.mrf.mxu0 }
 0x1dd   :  { %v3464_v5 = vadd.f32 %v3463_v3, %v3462_v2 }
 0x1de   :  { %v3465_v6 = vpop.f32.mrf.mxu0 }
 0x1df   :  { %v1224_v7 = vadd.f32 %v3464_v5, %v3193_v4 }
 0x1e0   :  { %v3466_v8 = vpop.f32.mrf.mxu0 }
 0x1e1   :  { %3733 = vtanh.f32 %v1224_v7  ;;  %v3467_v9 = vadd.f32 %v3466_v8, %v3465_v6 }
 0x1e2   :  { %v3468_v10 = vpop.f32.mrf.mxu0 }
 0x1e3   :  { %v1225_v11 = vadd.f32 %v3467_v9, %v3193_v4 }
 0x1e4   :  { %v3469_v13 = vpop.f32.mrf.mxu0 }
 0x1e5   :  { %3735 = vtanh.f32 %v1225_v11  ;;  %v3470_v16 = vadd.f32 %v3469_v13, %v3468_v10 }
 0x1e6   :  { %v3471_v17 = vpop.f32.mrf.mxu0 }
 0x1e7   :  { %v1226_v18 = vadd.f32 %v3470_v16, %v3193_v4 }
 0x1e8   :  { %v3472_v19 = vpop.f32.mrf.mxu0 }
 0x1e9   :  { %3737 = vtanh.f32 %v1226_v18  ;;  %v3473_v23 = vadd.f32 %v3472_v19, %v3471_v17 }
 0x1ea   :  { %v3474_v24 = vpop.f32.mrf.mxu0 }
 0x1eb   :  { %v1227_v25 = vadd.f32 %v3473_v23, %v3193_v4 }
 0x1ec   :  { %v3475_v26 = vpop.f32.mrf.mxu0 }
 0x1ed   :  { %3739 = vtanh.f32 %v1227_v25  ;;  %v3476_v28 = vadd.f32 %v3475_v26, %v3474_v24 }
 0x1ee   :  { %v3734_v31 = vpop.eup %3733  ;;  %v3477_v32 = vpop.f32.mrf.mxu0 }
 0x1ef   :  { %v1228_v33 = vadd.f32 %v3476_v28, %v3193_v4  ;;  %v1247_v34 = vmul.f32 %v3734_v31, %v3194_v27 }
 0x1f0   :  { %v3478_v35 = vpop.f32.mrf.mxu0 }
 0x1f1   :  { %3741 = vtanh.f32 %v1228_v33  ;;  %v3479_v36 = vadd.f32 %v3478_v35, %v3477_v32  ;;  %1255 = vadd.xlane.f32.xlu0 %v1247_v34  ;;  %v4232_v34 = vsub.s32 1, %v4147_v12  ;;  %v4235_v35 = vsub.s32 2, %v4147_v12 }
 0x1f2   :  { %v3736_v39 = vpop.eup %3735  ;;  %v3480_v40 = vpop.f32.mrf.mxu0 }
 0x1f3   :  { %v1229_v41 = vadd.f32 %v3479_v36, %v3193_v4  ;;  %v1248_v42 = vmul.f32 %v3736_v39, %v3194_v27  ;;  %v4238_v36 = vsub.s32 4, %v4147_v12  ;;  %v4241_v39 = vsub.s32 3, %v4147_v12 }
 0x1f4   :  { %v3481_v43 = vpop.f32.mrf.mxu0 }
 0x1f5   :  { %3743 = vtanh.f32 %v1229_v41  ;;  %v3482_v44 = vadd.f32 %v3481_v43, %v3480_v40  ;;  %1257 = vadd.xlane.f32.xlu1 %v1248_v42  ;;  %v4244_v40 = vsub.s32 6, %v4147_v12 }
 0x1f6   :  { %v3738_v45 = vpop.eup %3737  ;;  %v3483_v46 = vpop.f32.mrf.mxu0 }
 0x1f7   :  { %v1230_v47 = vadd.f32 %v3482_v44, %v3193_v4  ;;  %v1249_v48 = vmul.f32 %v3738_v45, %v3194_v27  ;;  %v4250_v45 = vsub.s32 5, %v4147_v12 }
 0x1f8   :  { %v3484_v49 = vpop.f32.mrf.mxu0 }
 0x1f9   :  { %3745 = vtanh.f32 %v1230_v47  ;;  %v3485_v50 = vadd.f32 %v3484_v49, %v3483_v46  ;;  %1259 = vadd.xlane.f32.xlu1 %v1249_v48 }
 0x1fa   :  { %v3740_v51 = vpop.eup %3739 }
 0x1fb   :  { %v1231_v52 = vadd.f32 %v3485_v50, %v3193_v4  ;;  %v1250_v53 = vmul.f32 %v3740_v51, %v3194_v27  ;;  %v4213_v4 = vsub.s32 %v4124_v37, %v4147_v12 }
 0x1fd   :  { %3747 = vtanh.f32 %v1231_v52  ;;  %1261 = vadd.xlane.f32.xlu1 %v1250_v53 }
 0x1fe   :  { %v3742_v54 = vpop.eup %3741 }
 0x1ff   :  { %v1251_v55 = vmul.f32 %v3742_v54, %v3194_v27 }
 0x201   :  { %1263 = vadd.xlane.f32.xlu1 %v1251_v55  ;;  %v4256_v55 = vsub.s32 7, %v4147_v12 }
 0x202   :  { %v3744_v56 = vpop.eup %3743 }
 0x203   :  { %v1252_v57 = vmul.f32 %v3744_v56, %v3194_v27 }
 0x205   :  { %1265 = vadd.xlane.f32.xlu1 %v1252_v57 }
 0x206   :  { %v3746_v58 = vpop.eup %3745 }
 0x207   :  { %v1253_v59 = vmul.f32 %v3746_v58, %v3194_v27 }
 0x209   :  { %1267 = vadd.xlane.f32.xlu1 %v1253_v59 }
 0x20a   :  { %v3748_v60 = vpop.eup %3747 }
 0x20b   :  { %v1254_v1 = vmul.f32 %v3748_v60, %v3194_v27 }
 0x20d   :  { %1269 = vadd.xlane.f32.xlu1 %v1254_v1 }
 0x27a   :  { %v1256_v7 = vpop.xlane.xlu0 %1255 }
 0x27b   :  { %v1282_v11 = vrot.slane %v1256_v7, %v4213_v4 }
 0x27e   :  { %v1258_v2 = vpop.xlane.xlu1 %1257 }
 0x27f   :  { %v1286_v9 = vrot.slane %v1258_v2, %v4213_v4 }
 0x281   :  { %v1312_v18 = vsel %vm1311_vm0, %v1286_v9, %v1282_v11 }
 0x282   :  { %v1260_v3 = vpop.xlane.xlu1 %1259 }
 0x283   :  { %v1290_v10 = vrot.slane %v1260_v3, %v4213_v4 }
 0x285   :  { %v1314_v19 = vsel %vm1313_vm1, %v1290_v10, %v1312_v18 }
 0x286   :  { %v1262_v5 = vpop.xlane.xlu1 %1261 }
 0x287   :  { %v1294_v13 = vrot.slane %v1262_v5, %v4213_v4 }
 0x289   :  { %v1316_v24 = vsel %vm1315_vm2, %v1294_v13, %v1314_v19 }
 0x28a   :  { %v1264_v6 = vpop.xlane.xlu1 %1263 }
 0x28b   :  { %v1298_v16 = vrot.slane %v1264_v6, %v4213_v4 }
 0x28d   :  { %v1318_v25 = vsel %vm1317_vm3, %v1298_v16, %v1316_v24 }
 0x28e   :  { %v1266_v8 = vpop.xlane.xlu1 %1265 }
 0x28f   :  { %v1302_v37 = vrot.slane %v1266_v8, %v4213_v4 }
 0x291   :  { %v1320_v28 = vsel %vm1319_vm4, %v1302_v37, %v1318_v25 }
 0x292   :  { %v1268_v17 = vpop.xlane.xlu1 %1267 }
 0x293   :  { %v1306_v23 = vrot.slane %v1268_v17, %v4213_v4 }
 0x295   :  { %v1322_v31 = vsel %vm1321_vm5, %v1306_v23, %v1320_v28 }
 0x296   :  { %v1270_v26 = vpop.xlane.xlu1 %1269 }
 0x297   :  { %v1310_v27 = vrot.slane %v1270_v26, %v4213_v4 }
 0x299   :  { %v1324_v32 = vsel %vm1323_vm6, %v1310_v27, %v1322_v31 }
 0x29a   :  { %v1327_v33 = vsel %vm1326_vm7, %v1324_v32, -inf }
 0x29b   :  { %1328 = vmax.xlane.f32.xlu1 %v1327_v33 }
 0x324   :  { %v1329_v41 = vpop.xlane.xlu1 %1328 }
 0x325   :  { %v1334_v42 = vrot.slane %v1329_v41, %v4169_v38  ;;  %v1338_v43 = vrot.slane %v1329_v41, %v4232_v34  ;;  %v1342_v44 = vrot.slane %v1329_v41, %v4235_v35  ;;  %v1350_v46 = vrot.slane %v1329_v41, %v4238_v36 }
 0x326   :  { %v1346_v47 = vrot.slane %v1329_v41, %v4241_v39  ;;  %v1358_v51 = vrot.slane %v1329_v41, %v4244_v40  ;;  %v1354_v56 = vrot.slane %v1329_v41, %v4250_v45  ;;  %v1362_v1 = vrot.slane %v1329_v41, %v4256_v55 }
 0x327   :  { %v1371_v48 = vsub.f32 %v1256_v7, %v1334_v42  ;;  %v1372_v49 = vsub.f32 %v1258_v2, %v1338_v43  ;;  %v1373_v50 = vsub.f32 %v1260_v3, %v1342_v44  ;;  %v1375_v52 = vsub.f32 %v1264_v6, %v1350_v46 }
 0x328   :  { %v1374_v57 = vsub.f32 %v1262_v5, %v1346_v47  ;;  %v1377_v59 = vsub.f32 %v1268_v17, %v1358_v51  ;;  %v1376_v2 = vsub.f32 %v1266_v8, %v1354_v56  ;;  %v1378_v7 = vsub.f32 %v1270_v26, %v1362_v1  ;;  %v3589_v56 = vld [vmem:[#allocation11 + $0x2e0] ss:$16 sps:$4 sm:$0xff]  }
 0x329   :  { %v1379_v53 = vmul.f32 1.442695, %v1371_v48  ;;  %v1381_v54 = vmul.f32 1.442695, %v1372_v49  ;;  %v1383_v58 = vmul.f32 1.442695, %v1373_v50 }
 0x32a   :  { %v1387_v60 = vmul.f32 1.442695, %v1375_v52  ;;  %v1385_v3 = vmul.f32 1.442695, %v1374_v57  ;;  %v1391_v6 = vmul.f32 1.442695, %v1377_v59 }
 0x32b   :  { %3749 = vpow2.f32 %v1379_v53  ;;  %v1389_v9 = vmul.f32 1.442695, %v1376_v2  ;;  %v1393_v12 = vmul.f32 1.442695, %v1378_v7  ;;  %v3591_v57 = vld [vmem:[#allocation11 + $0x2e4] ss:$16 sps:$4 sm:$0xff]  }
 0x32c   :  { %3751 = vpow2.f32 %v1381_v54  ;;  %2288 = vmatprep.subr.bf16.mxu0 %v3591_v57  ;;  %v3592_v59 = vld [vmem:[#allocation11 + $0x2c0] ss:$16 sps:$4 sm:$0xff]   ;;  %v3615_v2 = vld [vmem:[#allocation11 + $0xe4] ss:$16 sps:$4 sm:$0xff]  }
 0x32d   :  { %3753 = vpow2.f32 %v1383_v58  ;;  %v3594_v58 = vld [vmem:[#allocation11 + $0x2c4] ss:$16 sps:$4 sm:$0xff]   ;;  %2289 = vmatpush1.bf16.msra.mxu0 %v3589_v56  ;;  %v3613_v1 = vld [vmem:[#allocation11 + $0xe0] ss:$16 sps:$4 sm:$0xff]   ;;  %2247 = vmatprep.subr.bf16.mxu1 %v3615_v2 }
 0x32e   :  { %3755 = vpow2.f32 %v1387_v60  ;;  %2290 = vmatprep.subr.bf16.mxu0 %v3594_v58  ;;  %v3597_v60 = vld [vmem:[#allocation11 + $0x2a4] ss:$16 sps:$4 sm:$0xff]   ;;  %2248 = vmatpush1.bf16.msra.mxu1 %v3613_v1  ;;  %v3619_v7 = vld [vmem:[#allocation11 + $0xc0] ss:$16 sps:$4 sm:$0xff]   ;;  %v3640_v1 = vld [vmem:[#allocation11 + $0x68] ss:$16 sps:$4 sm:$0xff]  }
 0x32f   :  { %3757 = vpow2.f32 %v1385_v3  ;;  %v3595_v3 = vld [vmem:[#allocation11 + $0x2a0] ss:$16 sps:$4 sm:$0xff]   ;;  %v3639_v58 = vld [vmem:[#allocation11 + $0x64] ss:$16 sps:$4 sm:$0xff]  }
 0x330   :  { %3759 = vpow2.f32 %v1391_v6  ;;  %v3600_v6 = vld [vmem:[#allocation11 + $0x284] ss:$16 sps:$4 sm:$0xff]  }
 0x331   :  { %3761 = vpow2.f32 %v1389_v9  ;;  %2291 = vmatpush1.bf16.msra.mxu0 %v3592_v59  ;;  %v3627_v9 = vld [vmem:[#allocation11 + $0xa4] ss:$16 sps:$4 sm:$0xff]   ;;  %v3637_v59 = vld [vmem:[#allocation11 + $0x60] ss:$16 sps:$4 sm:$0xff]  }
 0x332   :  { %3763 = vpow2.f32 %v1393_v12  ;;  %2292 = vmatprep.subr.bf16.mxu0 %v3597_v60  ;;  %v3598_v12 = vld [vmem:[#allocation11 + $0x280] ss:$16 sps:$4 sm:$0xff]   ;;  %v3642_v60 = vld [vmem:[#allocation11 + $0x6c] ss:$16 sps:$4 sm:$0xff]  }
 0x335   :  { %2293 = vmatpush1.bf16.msra.mxu0 %v3595_v3  ;;  %v3645_v3 = vld [vmem:[#allocation11 + $0x44] ss:$16 sps:$4 sm:$0xff]  }
 0x336   :  { %2294 = vmatprep.subr.bf16.mxu0 %v3600_v6  ;;  %v3646_v6 = vld [vmem:[#allocation11 + $0x48] ss:$16 sps:$4 sm:$0xff]  }
 0x338   :  { %v4260_v10 = vpop.eup %3749 }
 0x339   :  { %v4262_v5 = vpop.eup %3751  ;;  %1404 = vperm.xlu1 %3508, %v4260_v10   ;;  %2295 = vmatpush1.bf16.msra.mxu0 %v3598_v12  ;;  %v3651_v12 = vld [vmem:[#allocation11 + $0x24] ss:$16 sps:$4 sm:$0xff]  }
 0x33a   :  { %1407 = vperm.xlu0 %3507, %v4262_v5   ;;  %v4266_v8 = vpop.eup %3753 }
 0x33b   :  { %v4268_v11 = vpop.eup %3755 }
 0x33c   :  { %v4272_v13 = vpop.eup %3757 }
 0x33d   :  { %1410 = vperm.xlu1 %3508, %v4266_v8   ;;  %v4274_v16 = vpop.eup %3759 }
 0x33e   :  { %1416 = vperm.xlu0 %3507, %v4268_v11   ;;  %v4278_v17 = vpop.eup %3761 }
 0x33f   :  { %v4281_v18 = vpop.eup %3763 }
 0x341   :  { %1413 = vperm.xlu1 %3508, %v4272_v13  }
 0x342   :  { %1422 = vperm.xlu0 %3507, %v4274_v16  }
 0x345   :  { %1419 = vperm.xlu1 %3508, %v4278_v17  }
 0x349   :  { %1425 = vperm.xlu1 %3508, %v4281_v18  }
 0x3b4   :  { %v1405_v37 = vpop.permute.xlu1 %1404 }
 0x3b5   :  { %v1408_v19 = vpop.permute.xlu0 %1407  ;;  %v1430_v25 = vrot.slane %v1405_v37, %v4213_v4  ;;  %v3603_v37 = vld [vmem:[#allocation11 + $0x264] ss:$16 sps:$4 sm:$0xff]  }
 0x3b6   :  { %v1434_v24 = vrot.slane %v1408_v19, %v4213_v4  ;;  %v3625_v19 = vld [vmem:[#allocation11 + $0xa0] ss:$16 sps:$4 sm:$0xff]   ;;  %2296 = vmatprep.subr.bf16.mxu0 %v3603_v37  ;;  %v3654_v37 = vld [vmem:[#allocation11 + $0x2c] ss:$16 sps:$4 sm:$0xff]  }
 0x3b8   :  { %v1411_v23 = vpop.permute.xlu1 %1410  ;;  %v1459_v31 = vsel %vm1311_vm0, %v1434_v24, %v1430_v25  ;;  %v3601_v24 = vld [vmem:[#allocation11 + $0x260] ss:$16 sps:$4 sm:$0xff]   ;;  %v3606_v25 = vld [vmem:[#allocation11 + $0x244] ss:$16 sps:$4 sm:$0xff]  }
 0x3b9   :  { %v1438_v26 = vrot.slane %v1411_v23, %v4213_v4  ;;  %v1417_v27 = vpop.permute.xlu0 %1416  ;;  %v3633_v23 = vld [vmem:[#allocation11 + $0x84] ss:$16 sps:$4 sm:$0xff]   ;;  %2297 = vmatpush1.bf16.msra.mxu0 %v3601_v24 }
 0x3ba   :  { %v1446_v42 = vrot.slane %v1417_v27, %v4213_v4  ;;  %v3604_v27 = vld [vmem:[#allocation11 + $0x240] ss:$16 sps:$4 sm:$0xff]   ;;  %2298 = vmatprep.subr.bf16.mxu0 %v3606_v25  ;;  %v3657_v25 = vld [vmem:[#allocation11 + $0x4] ss:$16 sps:$4 sm:$0xff]  }
 0x3bb   :  { %v1460_v33 = vsel %vm1313_vm1, %v1438_v26, %v1459_v31  ;;  %v3631_v26 = vld [vmem:[#allocation11 + $0x80] ss:$16 sps:$4 sm:$0xff]  }
 0x3bc   :  { %v1414_v28 = vpop.permute.xlu1 %1413  ;;  %v3607_v31 = vld [vmem:[#allocation11 + $0x220] ss:$16 sps:$4 sm:$0xff]  }
 0x3bd   :  { %v1442_v32 = vrot.slane %v1414_v28, %v4213_v4  ;;  %v1423_v44 = vpop.permute.xlu0 %1422  ;;  %v3609_v28 = vld [vmem:[#allocation11 + $0x224] ss:$16 sps:$4 sm:$0xff]   ;;  %2299 = vmatpush1.bf16.msra.mxu0 %v3604_v27  ;;  %v3658_v27 = vld [vmem:[#allocation11 + $0x8] ss:$16 sps:$4 sm:$0xff]  }
 0x3be   :  { %v1454_v49 = vrot.slane %v1423_v44, %v4213_v4  ;;  %2300 = vmatprep.subr.bf16.mxu0 %v3609_v28  ;;  %v3622_v44 = vld [vmem:[#allocation11 + $0xc8] ss:$16 sps:$4 sm:$0xff]  }
 0x3bf   :  { %v1461_v41 = vsel %vm1315_vm2, %v1442_v32, %v1460_v33  ;;  %v3612_v32 = vld [vmem:[#allocation11 + $0x204] ss:$16 sps:$4 sm:$0xff]   ;;  %v3610_v33 = vld [vmem:[#allocation11 + $0x200] ss:$16 sps:$4 sm:$0xff]  }
 0x3c0   :  { %v1420_v43 = vpop.permute.xlu1 %1419  ;;  %v1462_v47 = vsel %vm1317_vm3, %v1446_v42, %v1461_v41  ;;  %v3618_v41 = vld [vmem:[#allocation11 + $0xec] ss:$16 sps:$4 sm:$0xff]   ;;  %v3616_v42 = vld [vmem:[#allocation11 + $0xe8] ss:$16 sps:$4 sm:$0xff]  }
 0x3c1   :  { %v1450_v46 = vrot.slane %v1420_v43, %v4213_v4  ;;  %2301 = vmatpush1.bf16.msra.mxu0 %v3607_v31  ;;  %v3624_v43 = vld [vmem:[#allocation11 + $0xcc] ss:$16 sps:$4 sm:$0xff]  }
 0x3c2   :  { %2302 = vmatprep.subr.bf16.mxu0 %v3612_v32  ;;  %v3663_v32 = vld [vmem:[#allocation11 + $0x1e4] ss:$16 sps:$4 sm:$0xff]  }
 0x3c3   :  { %v1463_v48 = vsel %vm1319_vm4, %v1450_v46, %v1462_v47  ;;  %v3630_v46 = vld [vmem:[#allocation11 + $0xac] ss:$16 sps:$4 sm:$0xff]   ;;  %v3628_v47 = vld [vmem:[#allocation11 + $0xa8] ss:$16 sps:$4 sm:$0xff]  }
 0x3c4   :  { %v1426_v50 = vpop.permute.xlu1 %1425  ;;  %v1464_v52 = vsel %vm1321_vm5, %v1454_v49, %v1463_v48  ;;  %v3636_v48 = vld [vmem:[#allocation11 + $0x8c] ss:$16 sps:$4 sm:$0xff]   ;;  %v3634_v49 = vld [vmem:[#allocation11 + $0x88] ss:$16 sps:$4 sm:$0xff]  }
 0x3c5   :  { %v1458_v51 = vrot.slane %v1426_v50, %v4213_v4  ;;  %v3621_v4 = vld [vmem:[#allocation11 + $0xc4] ss:$16 sps:$4 sm:$0xff]   ;;  %2303 = vmatpush1.bf16.msra.mxu0 %v3610_v33  ;;  %v3666_v33 = vld [vmem:[#allocation11 + $0x1ec] ss:$16 sps:$4 sm:$0xff]  }
 0x3c6   :  { %2249 = vmatprep.subr.bf16.mxu1 %v3621_v4  ;;  %2329 = vmatprep.subr.bf16.mxu0 %v3618_v41  ;;  %v3643_v4 = vld [vmem:[#allocation11 + $0x40] ss:$16 sps:$4 sm:$0xff]   ;;  %v3664_v41 = vld [vmem:[#allocation11 + $0x1e8] ss:$16 sps:$4 sm:$0xff]  }
 0x3c7   :  { %v1465_v53 = vsel %vm1323_vm6, %v1458_v51, %v1464_v52  ;;  %2250 = vmatpush1.bf16.msra.mxu1 %v3619_v7 }
 0x3c8   :  { %v1467_v54 = vsel %vm1326_vm7, %v1465_v53, 0.0  ;;  %2251 = vmatprep.subr.bf16.mxu1 %v3627_v9  ;;  %2321 = vmatmul.mubr.bf16.vlgmr.msra.gmra.mxu0 %v4159_v22 }
 0x3c9   :  { %1468 = vadd.xlane.f32.xlu0 %v1467_v54  ;;  %2330 = vmatpush1.bf16.msra.mxu0 %v3616_v42 }
 0x3ca   :  { %2331 = vmatprep.subr.bf16.mxu0 %v3624_v43 }
 0x3cb   :  { %2252 = vmatpush1.bf16.msra.mxu1 %v3625_v19  ;;  %v3652_v19 = vld [vmem:[#allocation11 + $0x28] ss:$16 sps:$4 sm:$0xff]  }
 0x3cc   :  { %2253 = vmatprep.subr.bf16.mxu1 %v3633_v23 }
 0x3cd   :  { %2332 = vmatpush1.bf16.msra.mxu0 %v3622_v44  ;;  %v3669_v44 = vld [vmem:[#allocation11 + $0x1c4] ss:$16 sps:$4 sm:$0xff]  }
 0x3ce   :  { %2333 = vmatprep.subr.bf16.mxu0 %v3630_v46  ;;  %v3672_v46 = vld [vmem:[#allocation11 + $0x1cc] ss:$16 sps:$4 sm:$0xff]  }
 0x3cf   :  { %2254 = vmatpush1.bf16.msra.mxu1 %v3631_v26  ;;  %v3660_v26 = vld [vmem:[#allocation11 + $0xc] ss:$16 sps:$4 sm:$0xff]  }
 0x3d0   :  { %2255 = vmatprep.subr.bf16.mxu1 %v3639_v58  ;;  %v3690_v58 = vld [vmem:[#allocation11 + $0x16c] ss:$16 sps:$4 sm:$0xff]  }
 0x3d1   :  { %2334 = vmatpush1.bf16.msra.mxu0 %v3628_v47  ;;  %v3670_v47 = vld [vmem:[#allocation11 + $0x1c8] ss:$16 sps:$4 sm:$0xff]  }
 0x3d2   :  { %2335 = vmatprep.subr.bf16.mxu0 %v3636_v48 }
 0x3d3   :  { %2256 = vmatpush1.bf16.msra.mxu1 %v3637_v59  ;;  %v3688_v59 = vld [vmem:[#allocation11 + $0x168] ss:$16 sps:$4 sm:$0xff]  }
 0x3d4   :  { %2257 = vmatprep.subr.bf16.mxu1 %v3645_v3  ;;  %v3699_v3 = vld [vmem:[#allocation11 + $0x124] ss:$16 sps:$4 sm:$0xff]  }
 0x3d5   :  { %2336 = vmatpush1.bf16.msra.mxu0 %v3634_v49  ;;  %v3675_v49 = vld [vmem:[#allocation11 + $0x1a4] ss:$16 sps:$4 sm:$0xff]  }
 0x3d6   :  { %2337 = vmatprep.subr.bf16.mxu0 %v3642_v60  ;;  %v3693_v60 = vld [vmem:[#allocation11 + $0x144] ss:$16 sps:$4 sm:$0xff]  }
 0x3d7   :  { %2258 = vmatpush1.bf16.msra.mxu1 %v3643_v4  ;;  %v3697_v4 = vld [vmem:[#allocation11 + $0x120] ss:$16 sps:$4 sm:$0xff]  }
 0x3d8   :  { %2259 = vmatprep.subr.bf16.mxu1 %v3651_v12  ;;  %v3703_v12 = vld [vmem:[#allocation11 + $0x100] ss:$16 sps:$4 sm:$0xff]  }
 0x3d9   :  { %2338 = vmatpush1.bf16.msra.mxu0 %v3640_v1  ;;  %v3691_v1 = vld [vmem:[#allocation11 + $0x140] ss:$16 sps:$4 sm:$0xff]  }
 0x452   :  { %v1469_v50 = vpop.xlane.xlu0 %1468 }
 0x453   :  { %3765 = vrcp.f32 %v1469_v50  ;;  %v3673_v50 = vld [vmem:[#allocation11 + $0x1a0] ss:$16 sps:$4 sm:$0xff]  }
 0x460   :  { %v4301_v51 = vpop.eup %3765 }
 0x461   :  { %v1475_v52 = vrot.slane %v4301_v51, %v4169_v38  ;;  %v1479_v54 = vrot.slane %v4301_v51, %v4232_v34  ;;  %v1483_v57 = vrot.slane %v4301_v51, %v4235_v35  ;;  %v1491_v9 = vrot.slane %v4301_v51, %v4238_v36 }
 0x462   :  { %v1495_v24 = vrot.slane %v4301_v51, %v4250_v45  ;;  %v1499_v31 = vrot.slane %v4301_v51, %v4244_v40  ;;  %v1503_v43 = vrot.slane %v4301_v51, %v4256_v55 }
 0x463   :  { %v1512_v53 = vmul.f32 %v4260_v10, %v1475_v52  ;;  %v1513_v56 = vmul.f32 %v4262_v5, %v1479_v54  ;;  %v1514_v2 = vmul.f32 %v4266_v8, %v1483_v57  ;;  %v1487_v10 = vrot.slane %v4301_v51, %v4241_v39  ;;  %v3648_v5 = vld [vmem:[#allocation11 + $0x4c] ss:$16 sps:$4 sm:$0xff]   ;;  %v3649_v8 = vld [vmem:[#allocation11 + $0x20] ss:$16 sps:$4 sm:$0xff]   ;;  %v3681_v51 = vld [vmem:[#allocation11 + $0x184] ss:$16 sps:$4 sm:$0xff]  }
 0x464   :  { %2339 = vmatprep.subr.bf16.mxu0 %v3648_v5  ;;  %2260 = vmatpush1.bf16.msra.mxu1 %v3649_v8  ;;  %v1516_v23 = vmul.f32 %v4268_v11, %v1491_v9  ;;  %v1517_v28 = vmul.f32 %v4278_v17, %v1495_v24  ;;  %v3661_v11 = vld [vmem:[#allocation11 + $0x1e0] ss:$16 sps:$4 sm:$0xff]   ;;  %v1518_v42 = vmul.f32 %v4274_v16, %v1499_v31  ;;  %v3678_v52 = vld [vmem:[#allocation11 + $0x1ac] ss:$16 sps:$4 sm:$0xff]   ;;  %v3676_v16 = vld [vmem:[#allocation11 + $0x1a8] ss:$16 sps:$4 sm:$0xff]  }
 0x465   :  { %1522 = vperm.xlu1 %3508, %v1512_v53   ;;  %v1515_v7 = vmul.f32 %v4272_v13, %v1487_v10  ;;  %2340 = vmatpush1.bf16.msra.mxu0 %v3646_v6  ;;  %v3655_v13 = vld [vmem:[#allocation11] ss:$16 sps:$4 sm:$0xff]   ;;  %v1519_v48 = vmul.f32 %v4281_v18, %v1503_v43  ;;  %v3684_v54 = vld [vmem:[#allocation11 + $0x18c] ss:$16 sps:$4 sm:$0xff]   ;;  %v3687_v57 = vld [vmem:[#allocation11 + $0x164] ss:$16 sps:$4 sm:$0xff]  }
 0x466   :  { %2341 = vmatprep.subr.bf16.mxu0 %v3654_v37  ;;  %2261 = vmatprep.subr.bf16.mxu1 %v3657_v25  ;;  %v3667_v17 = vld [vmem:[#allocation11 + $0x1c0] ss:$16 sps:$4 sm:$0xff]   ;;  %v3694_v10 = vld [vmem:[#allocation11 + $0x148] ss:$16 sps:$4 sm:$0xff]   ;;  %v3702_v5 = vld [vmem:[#allocation11 + $0x12c] ss:$16 sps:$4 sm:$0xff]  }
 0x467   :  { %v3679_v53 = vld [vmem:[#allocation11 + $0x180] ss:$16 sps:$4 sm:$0xff]   ;;  %v3700_v6 = vld [vmem:[#allocation11 + $0x128] ss:$16 sps:$4 sm:$0xff]   ;;  %v3708_v9 = vld [vmem:[#allocation11 + $0x10c] ss:$16 sps:$4 sm:$0xff]  }
 0x468   :  { %2262 = vmatpush1.bf16.msra.mxu1 %v3655_v13  ;;  %v3685_v18 = vld [vmem:[#allocation11 + $0x160] ss:$16 sps:$4 sm:$0xff]   ;;  %v3706_v8 = vld [vmem:[#allocation11 + $0x108] ss:$16 sps:$4 sm:$0xff]   ;;  %v3711_v37 = vld [vmem:[#allocation11 + $0x2ec] ss:$16 sps:$4 sm:$0xff]  }
 0x469   :  { %1527 = vperm.xlu1 %3508, %v1513_v56   ;;  %2342 = vmatpush1.bf16.msra.mxu0 %v3652_v19  ;;  %v3682_v56 = vld [vmem:[#allocation11 + $0x188] ss:$16 sps:$4 sm:$0xff]  }
 0x46a   :  { %2343 = vmatprep.subr.bf16.mxu0 %v3660_v26  ;;  %2263 = vmatprep.subr.bf16.mxu1 %v3663_v32 }
 0x46c   :  { %2264 = vmatpush2.bf16.msra.mxu1 %v3661_v11 }
 0x46d   :  { %1532 = vperm.xlu1 %3508, %v1514_v2   ;;  %2344 = vmatpush1.bf16.msra.mxu0 %v3658_v27  ;;  %v3696_v2 = vld [vmem:[#allocation11 + $0x14c] ss:$16 sps:$4 sm:$0xff]  }
 0x46e   :  { %2345 = vmatprep.subr.bf16.mxu0 %v3666_v33  ;;  %2265 = vmatprep.subr.bf16.mxu1 %v3669_v44 }
 0x470   :  { %2266 = vmatpush2.bf16.msra.mxu1 %v3667_v17 }
 0x471   :  { %1537 = vperm.xlu1 %3508, %v1515_v7   ;;  %2346 = vmatpush2.bf16.msra.mxu0 %v3664_v41  ;;  %v3705_v7 = vld [vmem:[#allocation11 + $0x104] ss:$16 sps:$4 sm:$0xff]  }
 0x472   :  { %2347 = vmatprep.subr.bf16.mxu0 %v3672_v46  ;;  %2267 = vmatprep.subr.bf16.mxu1 %v3675_v49 }
 0x474   :  { %2268 = vmatpush2.bf16.msra.mxu1 %v3673_v50 }
 0x475   :  { %1542 = vperm.xlu1 %3508, %v1516_v23   ;;  %2348 = vmatpush2.bf16.msra.mxu0 %v3670_v47 }
 0x476   :  { %2349 = vmatprep.subr.bf16.mxu0 %v3678_v52  ;;  %2269 = vmatprep.subr.bf16.mxu1 %v3681_v51 }
 0x478   :  { %2270 = vmatpush2.bf16.msra.mxu1 %v3679_v53 }
 0x479   :  { %1547 = vperm.xlu1 %3508, %v1517_v28   ;;  %2350 = vmatpush2.bf16.msra.mxu0 %v3676_v16 }
 0x47a   :  { %2351 = vmatprep.subr.bf16.mxu0 %v3684_v54  ;;  %2271 = vmatprep.subr.bf16.mxu1 %v3687_v57 }
 0x47c   :  { %2272 = vmatpush2.bf16.msra.mxu1 %v3685_v18 }
 0x47d   :  { %1552 = vperm.xlu1 %3508, %v1518_v42   ;;  %2352 = vmatpush2.bf16.msra.mxu0 %v3682_v56 }
 0x47e   :  { %2353 = vmatprep.subr.bf16.mxu0 %v3690_v58  ;;  %2273 = vmatprep.subr.bf16.mxu1 %v3693_v60 }
 0x480   :  { %2274 = vmatpush2.bf16.msra.mxu1 %v3691_v1 }
 0x481   :  { %1557 = vperm.xlu1 %3508, %v1519_v48   ;;  %2354 = vmatpush2.bf16.msra.mxu0 %v3688_v59 }
 0x482   :  { %2355 = vmatprep.subr.bf16.mxu0 %v3696_v2  ;;  %2275 = vmatprep.subr.bf16.mxu1 %v3699_v3 }
 0x484   :  { %2276 = vmatpush2.bf16.msra.mxu1 %v3697_v4 }
 0x485   :  { %2356 = vmatpush2.bf16.msra.mxu0 %v3694_v10  ;;  %2277 = vmatprep.subr.bf16.mxu1 %v3705_v7 }
 0x486   :  { %2357 = vmatprep.subr.bf16.mxu0 %v3702_v5 }
 0x488   :  { %2278 = vmatpush2.bf16.msra.mxu1 %v3703_v12  ;;  %v4327_v23 = vpop.f32.mrf.mxu0 }
 0x489   :  { %2358 = vmatpush2.bf16.msra.mxu0 %v3700_v6  ;;  %2370 = vmatprep.subr.bf16.mxu1 %v3711_v37 }
 0x48a   :  { %2359 = vmatprep.subr.bf16.mxu0 %v3708_v9  ;;  %v4330_v13 = vpop.f32.mrf.mxu0 }
 0x48c   :  { %v2326_v27 = vpop.f32.mrf.mxu0 }
 0x48d   :  { %2360 = vmatpush2.bf16.msra.mxu0 %v3706_v8 }
 0x48e   :  { %v2327_v11 = vpop.f32.mrf.mxu0 }
 0x4e0   :  { %v1523_v19 = vpop.permute.xlu1 %1522 }
 0x4e1   :  { %v1560_v26 = vmul.f32 %v1523_v19, %v4154_v20 }
 0x4e3   :  { %v1568_v33 = vrot.slane %v1560_v26, 4 }
 0x4e4   :  { %v1528_v24 = vpop.permute.xlu1 %1527 }
 0x4e5   :  { %v1561_v25 = vmul.f32 %v1528_v24, %v4156_v21  ;;  %v1569_v17 = vadd.f32 %v1568_v33, %v1560_v26 }
 0x4e7   :  { %v1574_v31 = vrot.slane %v1561_v25, 4  ;;  %v1570_v50 = vrot.slane %v1569_v17, 2 }
 0x4e8   :  { %v1533_v28 = vpop.permute.xlu1 %1532 }
 0x4e9   :  { %v1562_v32 = vmul.f32 %v1533_v28, %v4177_v62  ;;  %v1575_v43 = vadd.f32 %v1574_v31, %v1561_v25  ;;  %v1571_v56 = vadd.f32 %v1570_v50, %v1569_v17 }
 0x4eb   :  { %v1580_v41 = vrot.slane %v1562_v32, 4  ;;  %v1576_v48 = vrot.slane %v1575_v43, 2  ;;  %v1572_v3 = vrot.slane %v1571_v56, 1 }
 0x4ec   :  { %v1538_v42 = vpop.permute.xlu1 %1537 }
 0x4ed   :  { %v1563_v44 = vmul.f32 %v1538_v42, %v4179_v63  ;;  %v1581_v46 = vadd.f32 %v1580_v41, %v1562_v32  ;;  %v1577_v53 = vadd.f32 %v1576_v48, %v1575_v43  ;;  %v1573_v24 = vadd.f32 %v1572_v3, %v1571_v56 }
 0x4ef   :  { %v1586_v47 = vrot.slane %v1563_v44, 4  ;;  %v1582_v20 = vrot.slane %v1581_v46, 2  ;;  %v1578_v1 = vrot.slane %v1577_v53, 1  ;;  %v1616_v43 = vpack.c.bf16 %v1573_v24, %v1573_v24  ;;  %v3729_v24 = vld [vmem:[#allocation11 + $0x22c] ss:$16 sps:$4 sm:$0xff]  }
 0x4f0   :  { %v1543_v21 = vpop.permute.xlu1 %1542 }
 0x4f1   :  { %v1587_v49 = vadd.f32 %v1586_v47, %v1563_v44  ;;  %v1564_v52 = vmul.f32 %v1543_v21, %v4187_v14  ;;  %v1583_v57 = vadd.f32 %v1582_v20, %v1581_v46  ;;  %v1632_v20 = vunpack.c.l.b16 %v1616_v43  ;;  %v2484_v43 = vld [vmem:[#allocation13 + $0x180] sm:$0xff] }
 0x4f3   :  { %v1588_v16 = vrot.slane %v1587_v49, 2  ;;  %v1592_v51 = vrot.slane %v1564_v52, 4  ;;  %v1584_v4 = vrot.slane %v1583_v57, 1 }
 0x4f4   :  { %v1548_v62 = vpop.permute.xlu1 %1547 }
 0x4f5   :  { %v1565_v54 = vmul.f32 %v1548_v62, %v4189_v15  ;;  %v1593_v18 = vadd.f32 %v1592_v51, %v1564_v52  ;;  %v1589_v63 = vadd.f32 %v1588_v16, %v1587_v49  ;;  %v1579_v15 = vadd.f32 %v1578_v1, %v1577_v53 }
 0x4f6   :  { %v1585_v25 = vadd.f32 %v1584_v4, %v1583_v57  ;;  %v3709_v4 = vld [vmem:[#allocation11 + $0x2e8] ss:$16 sps:$4 sm:$0xff]  }
 0x4f7   :  { %v1598_v58 = vrot.slane %v1565_v54, 4  ;;  %v1594_v59 = vrot.slane %v1593_v18, 2  ;;  %v1590_v5 = vrot.slane %v1589_v63, 1  ;;  %v1617_v32 = vpack.c.bf16 %v1579_v15, %v1579_v15  ;;  %v3718_v15 = vld [vmem:[#allocation11 + $0x288] ss:$16 sps:$4 sm:$0xff]  }
 0x4f8   :  { %v1553_v60 = vpop.permute.xlu1 %1552  ;;  %v1618_v42 = vpack.c.bf16 %v1585_v25, %v1585_v25  ;;  %v3727_v25 = vld [vmem:[#allocation11 + $0x228] ss:$16 sps:$4 sm:$0xff]  }
 0x4f9   :  { %v1599_v2 = vadd.f32 %v1598_v58, %v1565_v54  ;;  %v1566_v10 = vmul.f32 %v1553_v60, %v4197_v29  ;;  %v1595_v14 = vadd.f32 %v1594_v59, %v1593_v18  ;;  %v1591_v26 = vadd.f32 %v1590_v5, %v1589_v63  ;;  %v3714_v5 = vld [vmem:[#allocation11 + $0x2cc] ss:$16 sps:$4 sm:$0xff]  }
 0x4fa   :  { %v1633_v21 = vunpack.c.l.b16 %v1617_v32  ;;  %v1634_v50 = vunpack.c.l.b16 %v1618_v42 }
 0x4fb   :  { %v1600_v6 = vrot.slane %v1599_v2, 2  ;;  %v1604_v7 = vrot.slane %v1566_v10, 4  ;;  %v1596_v9 = vrot.slane %v1595_v14, 1  ;;  %v1619_v44 = vpack.c.bf16 %v1591_v26, %v1591_v26  ;;  %v3732_v26 = vld [vmem:[#allocation11 + $0x20c] ss:$16 sps:$4 sm:$0xff]  }
 0x4fc   :  { %v1558_v12 = vpop.permute.xlu1 %1557  ;;  %v1640_v53 = vsel %vm1311_vm0, %v1633_v21, %v1632_v20 }
 0x4fd   :  { %v1601_v8 = vadd.f32 %v1600_v6, %v1599_v2  ;;  %v1605_v37 = vadd.f32 %v1604_v7, %v1566_v10  ;;  %v1567_v19 = vmul.f32 %v1558_v12, %v4199_v30  ;;  %v1597_v29 = vadd.f32 %v1596_v9, %v1595_v14  ;;  %v3712_v6 = vld [vmem:[#allocation11 + $0x2c8] ss:$16 sps:$4 sm:$0xff]   ;;  %v3717_v7 = vld [vmem:[#allocation11 + $0x2ac] ss:$16 sps:$4 sm:$0xff]  }
 0x4fe   :  { %v1635_v52 = vunpack.c.l.b16 %v1619_v44  ;;  %v1641_v57 = vsel %vm1313_vm1, %v1634_v50, %v1640_v53  ;;  %v855_v14 = vpack.c.bf16 %v4206_v61, %v4206_v61  ;;  %v3715_v9 = vld [vmem:[#allocation11 + $0x2a8] ss:$16 sps:$4 sm:$0xff]   ;;  %v3720_v12 = vld [vmem:[#allocation11 + $0x28c] ss:$16 sps:$4 sm:$0xff]   ;;  %v2488_v44 = vld [vmem:[#allocation13 + $0x1a0] sm:$0xff] }
 0x4ff   :  { %v1602_v27 = vrot.slane %v1601_v8, 1  ;;  %v1606_v28 = vrot.slane %v1605_v37, 2  ;;  %v1610_v31 = vrot.slane %v1567_v19, 4  ;;  %v1620_v47 = vpack.c.bf16 %v1597_v29, %v1597_v29  ;;  %v3723_v61 = vld [vmem:[#allocation11 + $0x26c] ss:$16 sps:$4 sm:$0xff]   ;;  %v2468_v53 = vld [vmem:[#allocation13 + $0x100] sm:$0xff] }
 0x500   :  { %v1642_v63 = vsel %vm1315_vm2, %v1635_v52, %v1641_v57  ;;  %v2493_v29 = vld [vmem:[#allocation13 + $0x1c8] sm:$0xff] }
 0x501   :  { %v1603_v11 = vadd.f32 %v1602_v27, %v1601_v8  ;;  %v1607_v33 = vadd.f32 %v1606_v28, %v1605_v37  ;;  %v1611_v41 = vadd.f32 %v1610_v31, %v1567_v19  ;;  %v1636_v62 = vunpack.c.l.b16 %v1620_v47  ;;  %v3721_v8 = vld [vmem:[#allocation11 + $0x268] ss:$16 sps:$4 sm:$0xff]   ;;  %v3726_v37 = vld [vmem:[#allocation11 + $0x24c] ss:$16 sps:$4 sm:$0xff]   ;;  %v2492_v28 = vld [vmem:[#allocation13 + $0x1c0] sm:$0xff] }
 0x502   :  { %v3724_v19 = vld [vmem:[#allocation11 + $0x248] ss:$16 sps:$4 sm:$0xff]   ;;  %v2496_v31 = vld [vmem:[#allocation13 + $0x1e0] sm:$0xff] }
 0x503   :  { %v1608_v17 = vrot.slane %v1607_v33, 1  ;;  %v1612_v46 = vrot.slane %v1611_v41, 2  ;;  %v1621_v48 = vpack.c.bf16 %v1603_v11, %v1603_v11  ;;  %v1643_v59 = vsel %vm1317_vm3, %v1636_v62, %v1642_v63  ;;  %v3730_v27 = vld [vmem:[#allocation11 + $0x208] ss:$16 sps:$4 sm:$0xff]  }
 0x504   :  { %v3351_v32 = vcombine.high %v2492_v28, %v2496_v31  ;;  %v2497_v11 = vld [vmem:[#allocation13 + $0x1e8] sm:$0xff] }
 0x505   :  { %v1609_v30 = vadd.f32 %v1608_v17, %v1607_v33  ;;  %v1613_v49 = vadd.f32 %v1612_v46, %v1611_v41  ;;  %v1637_v54 = vunpack.c.l.b16 %v1621_v48  ;;  %v3350_v33 = vcombine.low %v2492_v28, %v2496_v31  ;;  %v2485_v17 = vld [vmem:[#allocation13 + $0x188] sm:$0xff]  ;;  %v4358_v28 = vld [vmem:[#allocation13 + $0x1f8] sm:$0xff] }
 0x506   :  { %v3352_v41 = vcombine.low %v2493_v29, %v2497_v11  ;;  %v3353_v42 = vcombine.high %v2493_v29, %v2497_v11  ;;  %v3343_v46 = vcombine.high %v2484_v43, %v2488_v44  ;;  %v2489_v47 = vld [vmem:[#allocation13 + $0x1a8] sm:$0xff] }
 0x507   :  { %v1622_v16 = vpack.c.bf16 %v1609_v30, %v1609_v30  ;;  %v1614_v51 = vrot.slane %v1613_v49, 1  ;;  %v1644_v1 = vsel %vm1319_vm4, %v1637_v54, %v1643_v59  ;;  %v3344_v21 = vcombine.low %v2485_v17, %v2489_v47  ;;  %v2476_v30 = vld [vmem:[#allocation13 + $0x140] sm:$0xff]  ;;  %v2477_v50 = vld [vmem:[#allocation13 + $0x148] sm:$0xff] }
 0x508   :  { %2903 = vmatprep.subr.bf16.mxu0 %v3353_v42  ;;  %v3345_v48 = vcombine.high %v2485_v17, %v2489_v47  ;;  %v2481_v52 = vld [vmem:[#allocation13 + $0x168] sm:$0xff]  ;;  %v2472_v54 = vld [vmem:[#allocation13 + $0x120] sm:$0xff] }
 0x509   :  { %v1615_v56 = vadd.f32 %v1614_v51, %v1613_v49  ;;  %v1638_v18 = vunpack.c.l.b16 %v1622_v16  ;;  %v2480_v49 = vld [vmem:[#allocation13 + $0x160] sm:$0xff]  ;;  %v3336_v51 = vcombine.low %v2477_v50, %v2481_v52  ;;  %v3337_v62 = vcombine.high %v2477_v50, %v2481_v52  ;;  %v2473_v63 = vld [vmem:[#allocation13 + $0x128] sm:$0xff] }
 0x50a   :  { %v3335_v20 = vcombine.high %v2476_v30, %v2480_v49  ;;  %v3334_v16 = vcombine.low %v2476_v30, %v2480_v49  ;;  %v3326_v57 = vcombine.low %v2468_v53, %v2472_v54  ;;  %v2464_v59 = vld [vmem:[#allocation13 + $0xe0] sm:$0xff]  ;;  %v2441_v17 = vld [vmem:[#allocation13 + $0x28] sm:$0xff] }
 0x50b   :  { %v1623_v58 = vpack.c.bf16 %v1615_v56, %v1615_v56  ;;  %v1645_v2 = vsel %vm1321_vm5, %v1638_v18, %v1644_v1  ;;  %v2469_v56 = vld [vmem:[#allocation13 + $0x108] sm:$0xff]  ;;  %v3327_v18 = vcombine.high %v2468_v53, %v2472_v54  ;;  %v2436_v42 = vld [vmem:[#allocation13] sm:$0xff] }
 0x50c   :  { %v3329_v1 = vcombine.high %v2469_v56, %v2473_v63 }
 0x50d   :  { %v1639_v60 = vunpack.c.l.b16 %v1623_v58  ;;  %v2460_v58 = vld [vmem:[#allocation13 + $0xc0] sm:$0xff] }
 0x50f   :  { %v1646_v10 = vsel %vm1323_vm6, %v1639_v60, %v1645_v2  ;;  %v3328_v60 = vcombine.low %v2469_v56, %v2473_v63  ;;  %v3319_v2 = vcombine.high %v2460_v58, %v2464_v59 }
 0x510   :  { %v1647_v3 = vpack.c.b16 %v1646_v10, %v1646_v10  ;;  %v2461_v10 = vld [vmem:[#allocation13 + $0xc8] sm:$0xff] }
 0x512   :  { %2279 = vmatprep.mubr.bf16.mxu1 %v1647_v3  ;;  %2361 = vmatprep.mubr.bf16.mxu0 %v1647_v3  ;;  %v2465_v3 = vld [vmem:[#allocation13 + $0xe8] sm:$0xff] }
 0x513   :  { %2280 = vmatmul.mubr.bf16.vlgmr.msra.gmra.mxu1 %v855_v14  ;;  %2362 = vmatmul.mubr.bf16.vlgmr.msra.gmra.mxu0 %v855_v14  ;;  %v3321_v14 = vcombine.high %v2461_v10, %v2465_v3 }
 0x514   :  { %2371 = vmatpush1.bf16.msra.mxu1 %v3709_v4  ;;  %2402 = vmatprep.mubr.bf16.mxu1 %v4010_v0  ;;  %v2452_v4 = vld [vmem:[#allocation13 + $0x80] sm:$0xff] }
 0x515   :  { %2372 = vmatprep.subr.bf16.mxu1 %v3714_v5  ;;  %2935 = vmatprep.mubr.bf16.mxu0 %v4010_v0  ;;  %v2456_v5 = vld [vmem:[#allocation13 + $0xa0] sm:$0xff] }
 0x516   :  { %2904 = vmatpush1.bf16.msra.mxu0 %v3352_v41  ;;  %v3310_v31 = vcombine.low %v2452_v4, %v2456_v5 }
 0x517   :  { %2905 = vmatprep.subr.bf16.mxu0 %v3345_v48 }
 0x518   :  { %2373 = vmatpush1.bf16.msra.mxu1 %v3712_v6  ;;  %v2453_v6 = vld [vmem:[#allocation13 + $0x88] sm:$0xff] }
 0x519   :  { %2374 = vmatprep.subr.bf16.mxu1 %v3717_v7  ;;  %v2457_v7 = vld [vmem:[#allocation13 + $0xa8] sm:$0xff] }
 0x51a   :  { %2906 = vmatpush1.bf16.msra.mxu0 %v3344_v21  ;;  %v3312_v11 = vcombine.low %v2453_v6, %v2457_v7 }
 0x51b   :  { %2907 = vmatprep.subr.bf16.mxu0 %v3337_v62 }
 0x51c   :  { %2375 = vmatpush1.bf16.msra.mxu1 %v3715_v9  ;;  %v3318_v9 = vcombine.low %v2460_v58, %v2464_v59 }
 0x51d   :  { %2376 = vmatprep.subr.bf16.mxu1 %v3720_v12  ;;  %v3320_v12 = vcombine.low %v2461_v10, %v2465_v3 }
 0x51e   :  { %2908 = vmatpush1.bf16.msra.mxu0 %v3336_v51 }
 0x51f   :  { %2909 = vmatprep.subr.bf16.mxu0 %v3329_v1 }
 0x520   :  { %2377 = vmatpush1.bf16.msra.mxu1 %v3718_v15  ;;  %v3311_v15 = vcombine.high %v2452_v4, %v2456_v5 }
 0x521   :  { %2378 = vmatprep.subr.bf16.mxu1 %v3723_v61  ;;  %v2444_v61 = vld [vmem:[#allocation13 + $0x40] sm:$0xff] }
 0x522   :  { %2910 = vmatpush1.bf16.msra.mxu0 %v3328_v60 }
 0x523   :  { %2911 = vmatprep.subr.bf16.mxu0 %v3321_v14 }
 0x524   :  { %2379 = vmatpush1.bf16.msra.mxu1 %v3721_v8  ;;  %v2448_v8 = vld [vmem:[#allocation13 + $0x60] sm:$0xff] }
 0x525   :  { %2380 = vmatprep.subr.bf16.mxu1 %v3726_v37  ;;  %v3313_v37 = vcombine.high %v2453_v6, %v2457_v7 }
 0x526   :  { %2912 = vmatpush1.bf16.msra.mxu0 %v3320_v12 }
 0x527   :  { %2913 = vmatprep.subr.bf16.mxu0 %v3313_v37 }
 0x528   :  { %2381 = vmatpush1.bf16.msra.mxu1 %v3724_v19  ;;  %v2445_v19 = vld [vmem:[#allocation13 + $0x48] sm:$0xff] }
 0x529   :  { %2382 = vmatprep.subr.bf16.mxu1 %v3729_v24  ;;  %v2449_v24 = vld [vmem:[#allocation13 + $0x68] sm:$0xff] }
 0x52a   :  { %v3305_v41 = vcombine.high %v2445_v19, %v2449_v24  ;;  %2914 = vmatpush1.bf16.msra.mxu0 %v3312_v11  ;;  %v3304_v47 = vcombine.low %v2445_v19, %v2449_v24 }
 0x52c   :  { %2383 = vmatpush1.bf16.msra.mxu1 %v3727_v25  ;;  %v4352_v25 = vld [vmem:[#allocation13 + $0x1d0] sm:$0xff]  ;;  %2915 = vmatprep.subr.bf16.mxu0 %v3305_v41 }
 0x52d   :  { %2384 = vmatprep.subr.bf16.mxu1 %v3732_v26  ;;  %v4354_v26 = vld [vmem:[#allocation13 + $0x1f0] sm:$0xff] }
 0x52e   :  { %v3354_v29 = vcombine.low %v4352_v25, %v4354_v26  ;;  %2916 = vmatpush1.bf16.msra.mxu0 %v3304_v47  ;;  %v3355_v49 = vcombine.high %v4352_v25, %v4354_v26  ;;  %v2486_v47 = vld [vmem:[#allocation13 + $0x190] sm:$0xff] }
 0x530   :  { %2385 = vmatpush1.bf16.msra.mxu1 %v3730_v27  ;;  %v4356_v27 = vld [vmem:[#allocation13 + $0x1d8] sm:$0xff] }
 0x531   :  { %2862 = vmatprep.subr.bf16.mxu1 %v3351_v32  ;;  %v3356_v32 = vcombine.low %v4356_v27, %v4358_v28  ;;  %v3357_v50 = vcombine.high %v4356_v27, %v4358_v28 }
 0x533   :  { %2403 = vmatmul.mubr.bf16.vlgmr.msra.gmra.mxu1 %v4159_v22  ;;  %v3342_v22 = vcombine.low %v2484_v43, %v2488_v44  ;;  %v2440_v43 = vld [vmem:[#allocation13 + $0x20] sm:$0xff]  ;;  %v2437_v44 = vld [vmem:[#allocation13 + $0x8] sm:$0xff] }
 0x534   :  { %2894 = vmatprep.mubr.bf16.mxu1 %v4010_v0  ;;  %2863 = vmatpush1.bf16.msra.mxu1 %v3350_v33  ;;  %v3303_v33 = vcombine.high %v2444_v61, %v2448_v8  ;;  %v3297_v21 = vcombine.high %v2437_v44, %v2441_v17  ;;  %v3294_v48 = vcombine.low %v2436_v42, %v2440_v43 }
 0x535   :  { %2864 = vmatprep.subr.bf16.mxu1 %v3343_v46  ;;  %v3302_v46 = vcombine.low %v2444_v61, %v2448_v8  ;;  %v3296_v30 = vcombine.low %v2437_v44, %v2441_v17 }
 0x536   :  { %2917 = vmatprep.subr.bf16.mxu0 %v3297_v21  ;;  %v2490_v21 = vld [vmem:[#allocation13 + $0x1b0] sm:$0xff] }
 0x537   :  { %2918 = vmatpush1.bf16.msra.mxu0 %v3296_v30  ;;  %v2491_v30 = vld [vmem:[#allocation13 + $0x1b8] sm:$0xff] }
 0x538   :  { %2865 = vmatpush1.bf16.msra.mxu1 %v3342_v22  ;;  %v3295_v22 = vcombine.high %v2436_v42, %v2440_v43  ;;  %2985 = vmatprep.subr.bf16.mxu0 %v3357_v50 }
 0x539   :  { %2866 = vmatprep.subr.bf16.mxu1 %v3335_v20  ;;  %v1745_v20 = vld [vmem:[%s4420_s9] sm:$0xf]  ;;  %s4013_s9 = smov [#allocation15]  }
 0x53a   :  { %v1750_v52 = vrot.slane %v1745_v20, %v4169_v38  ;;  %v1758_v14 = vrot.slane %v1745_v20, %v4235_v35  ;;  %v1762_v6 = vrot.slane %v1745_v20, %v4241_v39  ;;  %s3052_s21 = sshll.u32 %s4013_s9, 4  ;;  %s3053_s21 = int_to_ptr.vmem [resolvable:$true] %s3052_s21 }
 0x53b   :  { %s3923_s22 = scalar_lea.vmem %s3053_s21, 128  ;;  %p3928_p8 = scmp.lt.s32.totalorder %s3053_s21, %s3053_s21 }
 0x53c   :  { %2867 = vmatpush1.bf16.msra.mxu1 %v3334_v16  ;;  %v1754_v16 = vrot.slane %v1745_v20, %v4232_v34  ;;  %v3347_v20 = vcombine.high %v2486_v47, %v2490_v21  ;;  %p3924_p7 = scmp.ne.s32.totalorder %s3053_s21, %s3923_s22  ;;  %p3929_p9 = scmp.lt.s32.totalorder %s3923_s22, %s3923_s22 }
 0x53d   :  { %2868 = vmatprep.subr.bf16.mxu1 %v3327_v18 }
 0x53e   :  { %p3930_p10 = por %p3929_p9, %p3928_p8 }
 0x540   :  { %2869 = vmatpush1.bf16.msra.mxu1 %v3326_v57  ;;  %p3931_p11 = pnand %p3930_p10, %p3924_p7 }
 0x541   :  { %2870 = vmatprep.subr.bf16.mxu1 %v3319_v2 }
 0x544   :  { %2871 = vmatpush1.bf16.msra.mxu1 %v3318_v9 }
 0x545   :  { %2872 = vmatprep.subr.bf16.mxu1 %v3311_v15 }
 0x548   :  { %2873 = vmatpush1.bf16.msra.mxu1 %v3310_v31  ;;  %v857_v31 = vld [vmem:[#allocation2] sm:$0xff] }
 0x549   :  { %2874 = vmatprep.subr.bf16.mxu1 %v3303_v33 }
 0x54c   :  { %2875 = vmatpush1.bf16.msra.mxu1 %v3302_v46 }
 0x54d   :  { %2876 = vmatprep.subr.bf16.mxu1 %v3295_v22 }
 0x550   :  { %2877 = vmatpush1.bf16.msra.mxu1 %v3294_v48  ;;  %v2487_v48 = vld [vmem:[#allocation13 + $0x198] sm:$0xff] }
 0x551   :  { %2944 = vmatprep.subr.bf16.mxu1 %v3355_v49 }
 0x5d3   :  { %v2281_v51 = vpop.f32.mrf.mxu1  ;;  %v2363_v62 = vpop.f32.mrf.mxu0 }
 0x5d4   :  { %v2282_v53 = vadd.f32 %v2281_v51, %v1750_v52  ;;  %v2364_v9 = vadd.f32 %v2363_v62, %v1758_v14  ;;  %v3349_v52 = vcombine.high %v2487_v48, %v2491_v30  ;;  %v2482_v51 = vld [vmem:[#allocation13 + $0x170] sm:$0xff]  ;;  %v2479_v62 = vld [vmem:[#allocation13 + $0x158] sm:$0xff] }
 0x5d5   :  { %v2283_v54 = vpop.f32.mrf.mxu1  ;;  %v2365_v56 = vpop.f32.mrf.mxu0  ;;  %v2454_v14 = vld [vmem:[#allocation13 + $0x90] sm:$0xff] }
 0x5d6   :  { %v2284_v57 = vadd.f32 %v2283_v54, %v1754_v16  ;;  %v2323_v59 = vadd.f32 %v4327_v23, %v2282_v53  ;;  %v2478_v16 = vld [vmem:[#allocation13 + $0x150] sm:$0xff]  ;;  %v2483_v53 = vld [vmem:[#allocation13 + $0x178] sm:$0xff]  ;;  %v3346_v54 = vcombine.low %v2486_v47, %v2490_v21 }
 0x5d7   :  { %v2285_v18 = vpop.f32.mrf.mxu1  ;;  %v2367_v63 = vpop.f32.mrf.mxu0  ;;  %v3338_v25 = vcombine.low %v2478_v16, %v2482_v51  ;;  %v3340_v26 = vcombine.low %v2479_v62, %v2483_v53 }
 0x5d8   :  { %v2325_v58 = vadd.f32 %v4330_v13, %v2284_v57  ;;  %v3291_v10 = vmul.f32 -1.442695, %v2323_v59  ;;  %v2366_v13 = vadd.f32 %v2365_v56, %v1762_v6  ;;  %v3348_v56 = vcombine.low %v2487_v48, %v2491_v30  ;;  %v2470_v63 = vld [vmem:[#allocation13 + $0x110] sm:$0xff]  ;;  %v2471_v59 = vld [vmem:[#allocation13 + $0x118] sm:$0xff] }
 0x5d9   :  { %v2286_v60 = vpop.f32.mrf.mxu1  ;;  %v2368_v1 = vpop.f32.mrf.mxu0  ;;  %v3339_v57 = vcombine.high %v2478_v16, %v2482_v51  ;;  %v3341_v18 = vcombine.high %v2479_v62, %v2483_v53  ;;  %v2455_v6 = vld [vmem:[#allocation13 + $0x98] sm:$0xff] }
 0x5da   :  { %v3292_v2 = vmul.f32 -1.442695, %v2325_v58  ;;  %v2474_v58 = vld [vmem:[#allocation13 + $0x130] sm:$0xff]  ;;  %v2475_v60 = vld [vmem:[#allocation13 + $0x138] sm:$0xff] }
 0x5db   :  { %v3331_v27 = vcombine.high %v2470_v63, %v2474_v58  ;;  %v3333_v28 = vcombine.high %v2471_v59, %v2475_v60  ;;  %v2463_v1 = vld [vmem:[#allocation13 + $0xd8] sm:$0xff] }
 0x5dc   :  { %3767 = vpow2.f32 %v3292_v2  ;;  %v2467_v2 = vld [vmem:[#allocation13 + $0xf8] sm:$0xff] }
 0x5dd   :  { %3769 = vpow2.f32 %v3291_v10  ;;  %v3330_v10 = vcombine.low %v2470_v63, %v2474_v58 }
 0x5e9   :  { %v3768_v3 = vpop.eup %3767 }
 0x5ea   :  { %v3770_v4 = vpop.eup %3769  ;;  %v2420_v5 = vadd.f32 1.0, %v3768_v3  ;;  %v3332_v3 = vcombine.low %v2471_v59, %v2475_v60 }
 0x5eb   :  { %v2414_v7 = vadd.f32 1.0, %v3770_v4 }
 0x5ec   :  { %3771 = vrcp.f32 %v2420_v5  ;;  %v2458_v5 = vld [vmem:[#allocation13 + $0xb0] sm:$0xff] }
 0x5ed   :  { %3773 = vrcp.f32 %v2414_v7  ;;  %v2459_v7 = vld [vmem:[#allocation13 + $0xb8] sm:$0xff] }
 0x5f3   :  { %v2404_v12 = vpop.f32.mrf.mxu1 }
 0x5f4   :  { %v2405_v15 = vadd.f32 %v2404_v12, %v2364_v9  ;;  %v3324_v12 = vcombine.low %v2463_v1, %v2467_v2 }
 0x5f5   :  { %v2406_v23 = vpop.f32.mrf.mxu1 }
 0x5f6   :  { %3775 = vtanh.f32 %v2405_v15  ;;  %v2407_v61 = vadd.f32 %v2406_v23, %v2366_v13  ;;  %v3315_v13 = vcombine.high %v2454_v14, %v2458_v5  ;;  %v3317_v15 = vcombine.high %v2455_v6, %v2459_v7  ;;  %v2446_v23 = vld [vmem:[#allocation13 + $0x50] sm:$0xff] }
 0x5f7   :  { %v2408_v8 = vpop.f32.mrf.mxu1 }
 0x5f8   :  { %v3293_v37 = vmul.f32 -1.442695, %v2407_v61  ;;  %v2450_v61 = vld [vmem:[#allocation13 + $0x70] sm:$0xff]  ;;  %v2447_v8 = vld [vmem:[#allocation13 + $0x58] sm:$0xff] }
 0x5f9   :  { %v2409_v19 = vpop.f32.mrf.mxu1  ;;  %v3772_v24 = vpop.eup %3771 }
 0x5fa   :  { %3777 = vpow2.f32 %v3293_v37  ;;  %v3774_v11 = vpop.eup %3773  ;;  %v2430_v41 = vmul.f32 %v3772_v24, %v857_v31  ;;  %v2451_v37 = vld [vmem:[#allocation13 + $0x78] sm:$0xff]  ;;  %v3314_v19 = vcombine.low %v2454_v14, %v2458_v5  ;;  %v3316_v24 = vcombine.low %v2455_v6, %v2459_v7 }
 0x5fb   :  { %v3307_v31 = vcombine.high %v2446_v23, %v2450_v61 }
 0x603   :  { %v3776_v33 = vpop.eup %3775 }
 0x604   :  { %v2431_v42 = vmul.f32 %v3776_v33, %v3774_v11  ;;  %v3309_v11 = vcombine.high %v2447_v8, %v2451_v37  ;;  %v2438_v33 = vld [vmem:[#allocation13 + $0x10] sm:$0xff] }
 0x606   :  { %v2432_v43 = vadd.f32 %v2431_v42, %v2430_v41  ;;  %v2442_v41 = vld [vmem:[#allocation13 + $0x30] sm:$0xff]  ;;  %v2439_v42 = vld [vmem:[#allocation13 + $0x18] sm:$0xff] }
 0x607   :  { %v3778_v44 = vpop.eup %3777 }
 0x608   :  { %3035 = vst [vmem:[#allocation17] sm:$0xff] %v2432_v43  ;;  %v2427_v17 = vadd.f32 1.0, %v3778_v44  ;;  %3779 = vtanh.f32 %v2432_v43  ;;  %v2443_v43 = vld [vmem:[#allocation13 + $0x38] sm:$0xff]  ;;  %v3306_v44 = vcombine.low %v2446_v23, %v2450_v61 }
 0x609   :  { %v3301_v47 = vcombine.high %v2439_v42, %v2443_v43  ;;  %v3300_v21 = vcombine.low %v2439_v42, %v2443_v43 }
 0x60a   :  { %3781 = vrcp.f32 %v2427_v17  ;;  %v3308_v17 = vcombine.low %v2447_v8, %v2451_v37 }
 0x615   :  { %v3780_v46 = vpop.eup %3779 }
 0x617   :  { %v3782_v22 = vpop.eup %3781 }
 0x618   :  { %v2434_v49 = vmul.f32 %v3782_v22, %v3780_v46  ;;  %v3299_v46 = vcombine.high %v2438_v33, %v2442_v41  ;;  %v3298_v22 = vcombine.low %v2438_v33, %v2442_v41 }
 0x61a   :  { %v4377_v50 = vpack.c.bf16 %v2434_v49, %v2434_v49  ;;  %3034 = vst [vmem:[#allocation15] sm:$0xff] %v2434_v49 }
 0x61c   :  { %2895 = vmatmul.mubr.bf16.vlgmr.msra.gmra.mxu1 %v4377_v50  ;;  %2936 = vmatmul.mubr.bf16.vlgmr.msra.gmra.mxu0 %v4377_v50 }
 0x61d   :  { %2945 = vmatpush1.bf16.msra.mxu1 %v3354_v29  ;;  %2986 = vmatpush1.bf16.msra.mxu0 %v3356_v32  ;;  %v2462_v29 = vld [vmem:[#allocation13 + $0xd0] sm:$0xff] }
 0x61e   :  { %2946 = vmatprep.subr.bf16.mxu1 %v3347_v20  ;;  %2987 = vmatprep.subr.bf16.mxu0 %v3349_v52  ;;  %v2466_v32 = vld [vmem:[#allocation13 + $0xf0] sm:$0xff] }
 0x61f   :  { %2976 = vmatprep.mubr.bf16.mxu1 %v4010_v0  ;;  %3017 = vmatprep.mubr.bf16.mxu0 %v4010_v0  ;;  %v3323_v4 = vcombine.high %v2462_v29, %v2466_v32  ;;  %v3325_v0 = vcombine.high %v2463_v1, %v2467_v2  ;;  %v3322_v9 = vcombine.low %v2462_v29, %v2466_v32 }
 0x621   :  { %2947 = vmatpush1.bf16.msra.mxu1 %v3346_v54  ;;  %2988 = vmatpush1.bf16.msra.mxu0 %v3348_v56 }
 0x622   :  { %2948 = vmatprep.subr.bf16.mxu1 %v3339_v57  ;;  %2989 = vmatprep.subr.bf16.mxu0 %v3341_v18 }
 0x625   :  { %2949 = vmatpush1.bf16.msra.mxu1 %v3338_v25  ;;  %2990 = vmatpush1.bf16.msra.mxu0 %v3340_v26 }
 0x626   :  { %2950 = vmatprep.subr.bf16.mxu1 %v3331_v27  ;;  %2991 = vmatprep.subr.bf16.mxu0 %v3333_v28 }
 0x629   :  { %2951 = vmatpush1.bf16.msra.mxu1 %v3330_v10  ;;  %2992 = vmatpush1.bf16.msra.mxu0 %v3332_v3 }
 0x62a   :  { %2952 = vmatprep.subr.bf16.mxu1 %v3323_v4  ;;  %2993 = vmatprep.subr.bf16.mxu0 %v3325_v0 }
 0x62d   :  { %2953 = vmatpush1.bf16.msra.mxu1 %v3322_v9  ;;  %2994 = vmatpush1.bf16.msra.mxu0 %v3324_v12 }
 0x62e   :  { %2954 = vmatprep.subr.bf16.mxu1 %v3315_v13  ;;  %2995 = vmatprep.subr.bf16.mxu0 %v3317_v15 }
 0x631   :  { %2955 = vmatpush1.bf16.msra.mxu1 %v3314_v19  ;;  %2996 = vmatpush1.bf16.msra.mxu0 %v3316_v24 }
 0x632   :  { %2956 = vmatprep.subr.bf16.mxu1 %v3307_v31  ;;  %2997 = vmatprep.subr.bf16.mxu0 %v3309_v11 }
 0x635   :  { %2957 = vmatpush1.bf16.msra.mxu1 %v3306_v44  ;;  %2998 = vmatpush1.bf16.msra.mxu0 %v3308_v17 }
 0x636   :  { %2958 = vmatprep.subr.bf16.mxu1 %v3299_v46  ;;  %2999 = vmatprep.subr.bf16.mxu0 %v3301_v47 }
 0x639   :  { %2959 = vmatpush1.bf16.msra.mxu1 %v3298_v22  ;;  %3000 = vmatpush1.bf16.msra.mxu0 %v3300_v21 }
 0x63c   :  { %2977 = vmatmul.mubr.bf16.vlgmr.msra.gmra.mxu1 %v4377_v50  ;;  %3018 = vmatmul.mubr.bf16.vlgmr.msra.gmra.mxu0 %v4377_v50 }
 0x63d   :  { %3934 = shalt.err (!%p3931_p11)
}
 0x63e   :  { %3055 = dma.vmem_to_hbm [thread:$0]  %s3053_s21, 128, %s4424_s13, [#allocation16]  }
 0x63f   :  { %s4014_s23 = smov [#allocation17]  }
 0x640   :  { %s3062_s27 = sshll.u32 %s4014_s23, 4  ;;  %s3063_s27 = int_to_ptr.vmem [resolvable:$true] %s3062_s27 }
 0x641   :  { %s3943_s28 = scalar_lea.vmem %s3063_s27, 128  ;;  %p3948_p13 = scmp.lt.s32.totalorder %s3063_s27, %s3063_s27 }
 0x642   :  { %p3944_p12 = scmp.ne.s32.totalorder %s3063_s27, %s3943_s28  ;;  %p3949_p0 = scmp.lt.s32.totalorder %s3943_s28, %s3943_s28 }
 0x644   :  { %p3950_p1 = por %p3949_p0, %p3948_p13 }
 0x646   :  { %p3951_p2 = pnand %p3950_p1, %p3944_p12 }
 0x648   :  { %3954 = shalt.err (!%p3951_p2)
}
 0x649   :  { %3065 = dma.vmem_to_hbm [thread:$0]  %s3063_s27, 128, %s4425_s14, [#allocation16]   ;;  %v2500_v48 = vld [vmem:[%s4422_s11] sm:$0xff] }
 0x64a   :  { %v2505_v30 = vrot.slane %v2500_v48, %v4169_v38  ;;  %v2513_v49 = vrot.slane %v2500_v48, %v4235_v35  ;;  %v2509_v50 = vrot.slane %v2500_v48, %v4232_v34  ;;  %v2517_v20 = vrot.slane %v2500_v48, %v4241_v39  ;;  %s4015_s11 = smov [#allocation14]  }
 0x64b   :  { %v2521_v34 = vrot.slane %v2500_v48, %v4238_v36  ;;  %v2529_v39 = vrot.slane %v2500_v48, %v4244_v40  ;;  %v2525_v58 = vrot.slane %v2500_v48, %v4250_v45  ;;  %v2533_v59 = vrot.slane %v2500_v48, %v4256_v55  ;;  %s3042_s13 = sshll.u32 %s4015_s11, 4  ;;  %s3043_s13 = int_to_ptr.vmem [resolvable:$true] %s3042_s13 }
 0x64c   :  { %s3963_s14 = scalar_lea.vmem %s3043_s13, 1024  ;;  %p3968_p4 = scmp.lt.s32.totalorder %s3043_s13, %s3043_s13 }
 0x64d   :  { %p3964_p3 = scmp.ne.s32.totalorder %s3043_s13, %s3963_s14  ;;  %p3969_p5 = scmp.lt.s32.totalorder %s3963_s14, %s3963_s14 }
 0x64f   :  { %p3970_p6 = por %p3969_p5, %p3968_p4 }
 0x651   :  { %p3971_p7 = pnand %p3970_p6, %p3964_p3 }
 0x6dc   :  { %v2896_v52 = vpop.f32.mrf.mxu1  ;;  %v2937_v16 = vpop.f32.mrf.mxu0 }
 0x6dd   :  { %v2897_v51 = vadd.f32 %v2896_v52, %v2505_v30  ;;  %v2938_v62 = vadd.f32 %v2937_v16, %v2513_v49 }
 0x6de   :  { %v2898_v53 = vpop.f32.mrf.mxu1  ;;  %v2939_v54 = vpop.f32.mrf.mxu0 }
 0x6df   :  { %3026 = vst [vmem:[#allocation14] sm:$0xff] %v2897_v51  ;;  %3028 = vst [vmem:[#allocation14 + $0x10] sm:$0xff] %v2938_v62  ;;  %v2899_v56 = vadd.f32 %v2898_v53, %v2509_v50  ;;  %v2940_v57 = vadd.f32 %v2939_v54, %v2517_v20 }
 0x6e0   :  { %v2900_v18 = vpop.f32.mrf.mxu1  ;;  %v2941_v63 = vpop.f32.mrf.mxu0 }
 0x6e1   :  { %3027 = vst [vmem:[#allocation14 + $0x8] sm:$0xff] %v2899_v56  ;;  %3029 = vst [vmem:[#allocation14 + $0x18] sm:$0xff] %v2940_v57 }
 0x6e2   :  { %v2901_v38 = vpop.f32.mrf.mxu1  ;;  %v2942_v35 = vpop.f32.mrf.mxu0 }
 0x6fc   :  { %v2978_v60 = vpop.f32.mrf.mxu1  ;;  %v3019_v25 = vpop.f32.mrf.mxu0 }
 0x6fd   :  { %v2979_v26 = vadd.f32 %v2978_v60, %v2521_v34  ;;  %v3020_v27 = vadd.f32 %v3019_v25, %v2529_v39 }
 0x6fe   :  { %v2980_v28 = vpop.f32.mrf.mxu1  ;;  %v3021_v29 = vpop.f32.mrf.mxu0 }
 0x6ff   :  { %3030 = vst [vmem:[#allocation14 + $0x20] sm:$0xff] %v2979_v26  ;;  %3032 = vst [vmem:[#allocation14 + $0x30] sm:$0xff] %v3020_v27  ;;  %v2981_v32 = vadd.f32 %v2980_v28, %v2525_v58  ;;  %v3022_v1 = vadd.f32 %v3021_v29, %v2533_v59 }
 0x700   :  { %v2982_v36 = vpop.f32.mrf.mxu1  ;;  %v3023_v2 = vpop.f32.mrf.mxu0 }
 0x701   :  { %3031 = vst [vmem:[#allocation14 + $0x28] sm:$0xff] %v2981_v32  ;;  %3033 = vst [vmem:[#allocation14 + $0x38] sm:$0xff] %v3022_v1 }
 0x702   :  { %v2983_v40 = vpop.f32.mrf.mxu1  ;;  %v3024_v45 = vpop.f32.mrf.mxu0 }
 0x703   :  { %3974 = shalt.err (!%p3971_p7)
}
 0x704   :  { %3045 = dma.vmem_to_hbm [thread:$0]  %s3043_s13, 1024, %s4423_s12, [#allocation4]  }
 0x705   :  { %3991 = dma.done.wait [#allocation4], 1024  }
 0x706   :  { %3992 = vsyncadd [#allocation4], 4294966272 }
 0x707   :  { %3993 = dma.done.wait [#allocation16], 256  }
 0x708   :  { %3994 = vsyncadd [#allocation16], 4294967040 }
 0x709   :  { %3075 = vsyncpa [#allocation3], 1 }
 0x70a   :  { %3076 = vsyncpa [#allocation6], 1 }
 0x70b   :  { %3077 = vsyncpa [#allocation9], 1 }
 0x70c   :  { %3078 = vsyncpa [#allocation12], 1 }
 0x70d   :  { %3079 = vsyncpa [#allocation4], 1 }
 0x70e   :  { %3080 = vsyncpa [#allocation16], 1 }

</bundles_post_ra>
